<compile_context>
chip_gen: v6e
topology: v6e:2x2x1
jax: 0.10.0
libtpu: 0.0.40
codegen_flags: <defaults>
</compile_context>

<pallas_src>
import jax
import jax.numpy as jnp
from jax.experimental import pallas as pl
from jax.experimental.pallas import tpu as pltpu

KS = 3                    # 3x3 conv, stride 1, padding 1
BN_EPS = 1e-5
LANE = 128                # channel padding granularity (TPU lane width)
TILE_VMEM_BUDGET = 28 * 1024 * 1024   # per-tile working-set target (v7x-safe)
VMEM_LIMIT_BYTES = 48 * 1024 * 1024   # scoped VMEM cap (< 64 MiB v7x physical)


def _round_up(x, m):
    return (x + m - 1) // m * m


# --------------------------------------------------------------------------- #
# Kernel: fused (conv3x3 + BN + ReLU) x 2 on one (batch, row-tile) block.
# --------------------------------------------------------------------------- #
def _pair_kernel(x_ref, halo_ref, w1_ref, s1_ref, b1_ref, w2_ref, s2_ref,
                 b2_ref, o_ref, acc1_ref, acc2_ref):
    # x_ref:    (1, TH, Wp8, Cin)   bf16  rows [t*TH, t*TH+TH) (cols: 1px left pad,
    #                                     data in cols 1..W, zeros beyond)
    # halo_ref: (4, Wp8, Cin)       bf16  rows t*TH-2, t*TH-1, t*TH+TH, t*TH+TH+1
    #                                     (zeroed outside the image)
    # w*_ref:   (9, Cin, Cout)      bf16  taps, index ky*3+kx
    # s*/b*:    (1, Cout)           f32   folded BN scale / shift (incl. conv bias)
    # o_ref:    (1, TH, W, Cout)    f32
    # acc*_ref: VMEM f32 accumulators
    t = pl.program_id(1)
    nt = pl.num_programs(1)
    TH, W = o_ref.shape[1], o_ref.shape[2]
    Wp8 = x_ref.shape[2]
    WK = _round_up(W, 8)          # matmul column width (lane/sublane friendly)
    Cmid = w1_ref.shape[2]
    Cout = w2_ref.shape[2]

    def conv3x3(win, w_ref, acc_ref, rows_out):
        # win: (rows_out + 2, Wp8, Cin) bf16 -> (rows_out, WK, Cout) f32
        cin = win.shape[-1]
        cout = w_ref.shape[2]
        # Column-shifted windows built ONCE per layer (not per tap).
        shifted = [win[:, kx:kx + WK, :] for kx in range(KS)]
        m = rows_out * WK
        for ky in range(KS):
            for kx in range(KS):
                lhs = shifted[kx][ky:ky + rows_out].reshape(m, cin)
                p = jnp.dot(lhs, w_ref[ky * KS + kx],
                            preferred_element_type=jnp.float32)
                if ky == 0 and kx == 0:
                    acc_ref[...] = p
                else:
                    acc_ref[...] += p
        return acc_ref[...].reshape(rows_out, WK, cout)

    # ---- layer 1: conv + BN + ReLU on activation rows [t*TH-1, t*TH+TH+1) ----
    win1 = jnp.concatenate([halo_ref[0:2], x_ref[0], halo_ref[2:4]], axis=0)
    a1 = conv3x3(win1, w1_ref, acc1_ref, TH + 2)
    act1 = jnp.maximum(a1 * s1_ref[...].reshape(1, 1, Cmid)
                       + b1_ref[...].reshape(1, 1, Cmid), 0.0)

    # Rows -1 / H (only at the first / last tile) are conv2's zero padding.
    row = jax.lax.broadcasted_iota(jnp.int32, (TH + 2, 1, 1), 0)
    bad = jnp.logical_or(jnp.logical_and(row == 0, t == 0),
                         jnp.logical_and(row == TH + 1, t == nt - 1))
    act1m = jnp.where(bad, 0.0, act1).astype(jnp.bfloat16)

    # Conv2's input window: zero col pad on the left, activation cols 0..W-1,
    # zeros on the right (all in VMEM; the intermediate never hits HBM).
    zc = jnp.zeros((TH + 2, 1, Cmid), jnp.bfloat16)
    zr = jnp.zeros((TH + 2, Wp8 - W - 1, Cmid), jnp.bfloat16)
    mid2 = jnp.concatenate([zc, act1m[:, 0:W, :], zr], axis=1)   # (TH+2, Wp8, Cmid)

    # ---- layer 2: conv + BN + ReLU, write the lane-dense output tile ----
    a2 = conv3x3(mid2, w2_ref, acc2_ref, TH)
    y = jnp.maximum(a2 * s2_ref[...].reshape(1, 1, Cout)
                    + b2_ref[...].reshape(1, 1, Cout), 0.0)
    o_ref[0] = y[:, 0:W, :].astype(o_ref.dtype)


# --------------------------------------------------------------------------- #
# Wrapper: tiling, padding, halo gather, BN folding.
# --------------------------------------------------------------------------- #
def _vmem_bytes_estimate(th, W, WK, Wp8, cin_p, cmid_p, cout_p):
    bf, f4 = 2, 4
    io = (2 * th * Wp8 * cin_p * bf            # input tile, double-buffered
          + 2 * 4 * Wp8 * cin_p * bf           # halo tile, double-buffered
          + 2 * th * W * cout_p * f4)          # output tile, double-buffered
    wts = 2 * 9 * (cin_p * cmid_p + cmid_p * cout_p) * bf
    accs = (th + 2) * WK * cmid_p * f4 + th * WK * cout_p * f4
    tmps = ((th + 4) * Wp8 * cin_p * bf        # assembled window
            + 2 * (th + 4) * WK * cin_p * bf   # shifted copies (layer 1)
            + (th + 2) * WK * cmid_p * f4      # conv1 activation (f32)
            + (th + 2) * Wp8 * cmid_p * bf     # conv2 input window
            + 2 * (th + 2) * WK * cmid_p * bf)  # shifted copies (layer 2)
    return io + wts + accs + tmps


def _choose_tile_rows(H, W, WK, Wp8, cin_p, cmid_p, cout_p):
    best = 1
    for th in range(1, H + 1):
        if H % th == 0 and _vmem_bytes_estimate(
                th, W, WK, Wp8, cin_p, cmid_p, cout_p) <= TILE_VMEM_BUDGET:
            best = th
    return best


def _fold_bn(p, cin_p, cout_p):
    """OIHW conv weight + BN(eval) -> padded (9,Cin_p,Cout_p) bf16 taps, f32 scale/shift."""
    w = p["w"]                                   # (Cout, Cin, 3, 3)
    cout, cin = w.shape[0], w.shape[1]
    w9 = jnp.transpose(w, (2, 3, 1, 0)).reshape(KS * KS, cin, cout)
    w9 = jnp.pad(w9, ((0, 0), (0, cin_p - cin), (0, cout_p - cout)))
    scale = p["gamma"] * jax.lax.rsqrt(p["var"] + BN_EPS)
    shift = (p["b"] - p["mean"]) * scale + p["beta"]
    scale = jnp.pad(scale, (0, cout_p - cout)).reshape(1, cout_p).astype(jnp.float32)
    shift = jnp.pad(shift, (0, cout_p - cout)).reshape(1, cout_p).astype(jnp.float32)
    return w9.astype(jnp.bfloat16), scale, shift


def conv_bn_relu_pair(x_nhwc, pa, pb, tile_rows=None):
    """Two fused Conv2d(3,3,1,1)+BN(eval)+ReLU blocks. x_nhwc: (N,H,W,Cin) f32."""
    N, H, W, Cin = x_nhwc.shape
    Cmid, Cout = pa["w"].shape[0], pb["w"].shape[0]
    Cin_p = _round_up(Cin, LANE)
    Cmid_p = _round_up(Cmid, LANE)
    Cout_p = _round_up(Cout, LANE)
    WK = _round_up(W, 8)
    Wp8 = WK + 8                                   # 1px left pad + data + right zeros

    TH = tile_rows if tile_rows is not None else _choose_tile_rows(
        H, W, WK, Wp8, Cin_p, Cmid_p, Cout_p)
    assert H % TH == 0, (H, TH)
    T = H // TH

    w1, s1, b1 = _fold_bn(pa, Cin_p, Cmid_p)
    w2, s2, b2 = _fold_bn(pb, Cmid_p, Cout_p)

    # Column (conv1 left pad) + lane-friendly right pad + channel pad + bf16 cast.
    xcp = jnp.pad(x_nhwc, ((0, 0), (0, 0), (1, Wp8 - W - 1),
                           (0, Cin_p - Cin))).astype(jnp.bfloat16)

    # Per-tile 4-row halo (2 above + 2 below each tile, zeros outside the image),
    # gathered once in the wrapper so the kernel's BlockSpecs never overlap.
    starts = jnp.arange(T) * TH
    ridx = jnp.concatenate([starts[:, None] + jnp.array([-2, -1]),
                            starts[:, None] + jnp.array([TH, TH + 1])], axis=1)
    valid = ((ridx >= 0) & (ridx < H)).astype(xcp.dtype)            # (T, 4)
    halo = jnp.take(xcp, jnp.clip(ridx, 0, H - 1).reshape(-1), axis=1)
    halo = halo.reshape(N, T, 4, Wp8, Cin_p) * valid[None, :, :, None, None]
    halo = halo.reshape(N * T * 4, Wp8, Cin_p)

    out = pl.pallas_call(
        _pair_kernel,
        out_shape=jax.ShapeDtypeStruct((N, H, W, Cout_p), jnp.float32),
        grid=(N, T),
        in_specs=[
            pl.BlockSpec((1, TH, Wp8, Cin_p), lambda n, t: (n, t, 0, 0)),
            pl.BlockSpec((4, Wp8, Cin_p), lambda n, t: (n * T + t, 0, 0)),
            pl.BlockSpec((KS * KS, Cin_p, Cmid_p), lambda n, t: (0, 0, 0)),
            pl.BlockSpec((1, Cmid_p), lambda n, t: (0, 0)),
            pl.BlockSpec((1, Cmid_p), lambda n, t: (0, 0)),
            pl.BlockSpec((KS * KS, Cmid_p, Cout_p), lambda n, t: (0, 0, 0)),
            pl.BlockSpec((1, Cout_p), lambda n, t: (0, 0)),
            pl.BlockSpec((1, Cout_p), lambda n, t: (0, 0)),
        ],
        out_specs=pl.BlockSpec((1, TH, W, Cout_p), lambda n, t: (n, t, 0, 0)),
        scratch_shapes=[
            pltpu.VMEM(((TH + 2) * WK, Cmid_p), jnp.float32),
            pltpu.VMEM((TH * WK, Cout_p), jnp.float32),
        ],
        compiler_params=pltpu.CompilerParams(
            dimension_semantics=("parallel", "parallel"),
            vmem_limit_bytes=VMEM_LIMIT_BYTES),
    )(xcp, halo, w1, s1, b1, w2, s2, b2)
    return out[..., :Cout]


def _identity_params(p):
    """Identity Conv+BN+ReLU layer (used only when n is odd); ReLU is idempotent."""
    c = p["w"].shape[0]
    w = jnp.zeros((c, c, KS, KS), jnp.float32)
    w = w.at[jnp.arange(c), jnp.arange(c), 1, 1].set(1.0)
    z = jnp.zeros((c,), jnp.float32)
    o = jnp.ones((c,), jnp.float32)
    return dict(w=w, b=z, gamma=o, beta=z, mean=z, var=o)


def unet_conv2_forward(x_nchw, params, tile_rows=None):
    """unetConv2.forward (is_batchnorm=True, eval-mode BN). Input/output NCHW."""
    x = jnp.transpose(x_nchw, (0, 2, 3, 1))      # NCHW -> NHWC
    i = 0
    while i < len(params):
        if i + 1 < len(params):
            pa, pb = params[i], params[i + 1]
            i += 2
        else:
            pa, pb = params[i], _identity_params(params[i])
            i += 1
        x = conv_bn_relu_pair(x, pa, pb, tile_rows)
    return jnp.transpose(x, (0, 3, 1, 2))        # NHWC -> NCHW


# --------------------------------------------------------------------------- #
# Pure-JAX reference and test harness.
# --------------------------------------------------------------------------- #
def ref_forward(x_nchw, params):
    y = x_nchw
    for p in params:
        y = jax.lax.conv_general_dilated(
            y, p["w"], window_strides=(1, 1), padding=((1, 1), (1, 1)),
            dimension_numbers=("NCHW", "OIHW", "NCHW"))
        y = y + p["b"][None, :, None, None]
        s = p["gamma"] * jax.lax.rsqrt(p["var"] + BN_EPS)
        y = (y - p["mean"][None, :, None, None]) * s[None, :, None, None] \
            + p["beta"][None, :, None, None]
        y = jnp.maximum(y, 0.0)
    return y


def make_params(key, in_size, out_size, n=2):
    params = []
    cin = in_size
    for _ in range(n):
        key, kw, kb, kg, kbe, km, kv = jax.random.split(key, 7)
        params.append(dict(
            w=0.1 * jax.random.normal(kw, (out_size, cin, KS, KS), jnp.float32),
            b=0.1 * jax.random.normal(kb, (out_size,), jnp.float32),
            gamma=jax.random.uniform(kg, (out_size,), jnp.float32, 0.8, 1.2),
            beta=0.1 * jax.random.normal(kbe, (out_size,), jnp.float32),
            mean=0.1 * jax.random.normal(km, (out_size,), jnp.float32),
            var=jax.random.uniform(kv, (out_size,), jnp.float32, 0.5, 1.5),
        ))
        cin = out_size
    return params


if __name__ == "__main__":
    key = jax.random.PRNGKey(0)
    kx_, kp = jax.random.split(key)

    N, in_size, out_size, H, W = 2, 4, 8, 16, 16
    x = jax.random.normal(kx_, (N, in_size, H, W), jnp.float32)   # NCHW
    params = make_params(kp, in_size, out_size, n=2)

    # Forced small row tiles (exercises the halo/tiling path) + auto-tiled path.
    fwd_tiled = jax.jit(lambda xx: unet_conv2_forward(xx, params, tile_rows=4))
    fwd_auto = jax.jit(lambda xx: unet_conv2_forward(xx, params))

    out_t = jax.block_until_ready(fwd_tiled(x))
    out_a = jax.block_until_ready(fwd_auto(x))
    ref = ref_forward(x, params)

    assert out_t.shape == (N, out_size, H, W), out_t.shape
    assert out_a.shape == (N, out_size, H, W), out_a.shape
    # bf16 MXU inputs -> tolerance looser than pure-f32 math.
    for o in (out_t, out_a):
        err = float(jnp.max(jnp.abs(o - ref)))
        assert jnp.allclose(o, ref, atol=5e-2, rtol=5e-2), err

    print("KERNEL_OK")
</pallas_src>

<mosaic_0001>
module attributes {stable_mosaic.version = 11 : i64} {
  func.func @_pair_kernel(%arg0: i32, %arg1: i32, %arg2: memref<1x4x24x128xbf16, #tpu.memory_space<vmem>>, %arg3: memref<4x24x128xbf16, #tpu.memory_space<vmem>>, %arg4: memref<9x128x128xbf16, #tpu.memory_space<vmem>>, %arg5: memref<1x128xf32, #tpu.memory_space<vmem>>, %arg6: memref<1x128xf32, #tpu.memory_space<vmem>>, %arg7: memref<9x128x128xbf16, #tpu.memory_space<vmem>>, %arg8: memref<1x128xf32, #tpu.memory_space<vmem>>, %arg9: memref<1x128xf32, #tpu.memory_space<vmem>>, %arg10: memref<1x4x16x128xf32, #tpu.memory_space<vmem>>, %arg11: memref<96x128xf32, #tpu.memory_space<vmem>>, %arg12: memref<64x128xf32, #tpu.memory_space<vmem>>) attributes {dimension_semantics = [#tpu.dimension_semantics<parallel>, #tpu.dimension_semantics<parallel>], iteration_bounds = array<i64: 2, 4>, scalar_prefetch = 0 : i64, scratch_operands = 2 : i64, tpu.core_type = #tpu.core_type<tc>, window_params = [{transform_indices = @transform_0, window_bounds = array<i64: 1, 4, 24, 128>}, {transform_indices = @transform_1, window_bounds = array<i64: 4, 24, 128>}, {pipeline_mode = #tpu.pipeline_mode<synchronous>, transform_indices = @transform_2, window_bounds = array<i64: 9, 128, 128>}, {pipeline_mode = #tpu.pipeline_mode<synchronous>, transform_indices = @transform_3, window_bounds = array<i64: 1, 128>}, {pipeline_mode = #tpu.pipeline_mode<synchronous>, transform_indices = @transform_4, window_bounds = array<i64: 1, 128>}, {pipeline_mode = #tpu.pipeline_mode<synchronous>, transform_indices = @transform_5, window_bounds = array<i64: 9, 128, 128>}, {pipeline_mode = #tpu.pipeline_mode<synchronous>, transform_indices = @transform_6, window_bounds = array<i64: 1, 128>}, {pipeline_mode = #tpu.pipeline_mode<synchronous>, transform_indices = @transform_7, window_bounds = array<i64: 1, 128>}, {transform_indices = @transform_8, window_bounds = array<i64: 1, 4, 16, 128>}]} {
    %c0 = arith.constant 0 : index
    %c0_0 = arith.constant 0 : index
    %c0_1 = arith.constant 0 : index
    %0 = vector.load %arg3[%c0, %c0_0, %c0_1] : memref<4x24x128xbf16, #tpu.memory_space<vmem>>, vector<2x24x128xbf16>
    %c0_2 = arith.constant 0 : index
    %c0_3 = arith.constant 0 : index
    %c0_4 = arith.constant 0 : index
    %c0_5 = arith.constant 0 : index
    %1 = vector.load %arg2[%c0_2, %c0_3, %c0_4, %c0_5] : memref<1x4x24x128xbf16, #tpu.memory_space<vmem>>, vector<1x4x24x128xbf16>
    %2 = vector.shape_cast %1 : vector<1x4x24x128xbf16> to vector<4x24x128xbf16>
    %c2 = arith.constant 2 : index
    %c0_6 = arith.constant 0 : index
    %c0_7 = arith.constant 0 : index
    %3 = vector.load %arg3[%c2, %c0_6, %c0_7] : memref<4x24x128xbf16, #tpu.memory_space<vmem>>, vector<2x24x128xbf16>
    %4 = tpu.concatenate %0, %2, %3 in 0 : vector<2x24x128xbf16>, vector<4x24x128xbf16>, vector<2x24x128xbf16> -> vector<8x24x128xbf16>
    %5 = vector.extract_strided_slice %4 {offsets = [0, 0, 0], sizes = [8, 16, 128], strides = [1, 1, 1]} : vector<8x24x128xbf16> to vector<8x16x128xbf16>
    %6 = vector.extract_strided_slice %4 {offsets = [0, 1, 0], sizes = [8, 16, 128], strides = [1, 1, 1]} : vector<8x24x128xbf16> to vector<8x16x128xbf16>
    %7 = vector.extract_strided_slice %4 {offsets = [0, 2, 0], sizes = [8, 16, 128], strides = [1, 1, 1]} : vector<8x24x128xbf16> to vector<8x16x128xbf16>
    %8 = vector.extract_strided_slice %5 {offsets = [0, 0, 0], sizes = [6, 16, 128], strides = [1, 1, 1]} : vector<8x16x128xbf16> to vector<6x16x128xbf16>
    %9 = vector.shape_cast %8 : vector<6x16x128xbf16> to vector<96x128xbf16>
    %c0_8 = arith.constant 0 : index
    %c0_9 = arith.constant 0 : index
    %c0_10 = arith.constant 0 : index
    %10 = vector.load %arg4[%c0_8, %c0_9, %c0_10] : memref<9x128x128xbf16, #tpu.memory_space<vmem>>, vector<1x128x128xbf16>
    %11 = vector.shape_cast %10 : vector<1x128x128xbf16> to vector<128x128xbf16>
    %cst = arith.constant dense<0.000000e+00> : vector<96x128xf32>
    %12 = tpu.matmul %9, %11, %cst {dimension_numbers = #tpu.dot_dimension_numbers<[1], [0], [0], [1], [0, 0, 1, 1], [], []>} : vector<96x128xbf16>, vector<128x128xbf16>, vector<96x128xf32> -> vector<96x128xf32>
    %c0_11 = arith.constant 0 : index
    %c0_12 = arith.constant 0 : index
    %13 = vector.load %arg11[%c0_11, %c0_12] : memref<96x128xf32, #tpu.memory_space<vmem>>, vector<96x128xf32>
    tpu.vector_store %arg11[%c0_11, %c0_12], %12 {strides = array<i32>} : memref<96x128xf32, #tpu.memory_space<vmem>>, vector<96x128xf32>,
    %14 = vector.extract_strided_slice %6 {offsets = [0, 0, 0], sizes = [6, 16, 128], strides = [1, 1, 1]} : vector<8x16x128xbf16> to vector<6x16x128xbf16>
    %15 = vector.shape_cast %14 : vector<6x16x128xbf16> to vector<96x128xbf16>
    %c1 = arith.constant 1 : index
    %c0_13 = arith.constant 0 : index
    %c0_14 = arith.constant 0 : index
    %16 = vector.load %arg4[%c1, %c0_13, %c0_14] : memref<9x128x128xbf16, #tpu.memory_space<vmem>>, vector<1x128x128xbf16>
    %17 = vector.shape_cast %16 : vector<1x128x128xbf16> to vector<128x128xbf16>
    %cst_15 = arith.constant dense<0.000000e+00> : vector<96x128xf32>
    %18 = tpu.matmul %15, %17, %cst_15 {dimension_numbers = #tpu.dot_dimension_numbers<[1], [0], [0], [1], [0, 0, 1, 1], [], []>} : vector<96x128xbf16>, vector<128x128xbf16>, vector<96x128xf32> -> vector<96x128xf32>
    %c0_16 = arith.constant 0 : index
    %c0_17 = arith.constant 0 : index
    %19 = vector.load %arg11[%c0_16, %c0_17] : memref<96x128xf32, #tpu.memory_space<vmem>>, vector<96x128xf32>
    %20 = arith.addf %19, %18 : vector<96x128xf32>
    %c0_18 = arith.constant 0 : index
    %c0_19 = arith.constant 0 : index
    %21 = vector.load %arg11[%c0_18, %c0_19] : memref<96x128xf32, #tpu.memory_space<vmem>>, vector<96x128xf32>
    tpu.vector_store %arg11[%c0_18, %c0_19], %20 {strides = array<i32>} : memref<96x128xf32, #tpu.memory_space<vmem>>, vector<96x128xf32>,
    %22 = vector.extract_strided_slice %7 {offsets = [0, 0, 0], sizes = [6, 16, 128], strides = [1, 1, 1]} : vector<8x16x128xbf16> to vector<6x16x128xbf16>
    %23 = vector.shape_cast %22 : vector<6x16x128xbf16> to vector<96x128xbf16>
    %c2_20 = arith.constant 2 : index
    %c0_21 = arith.constant 0 : index
    %c0_22 = arith.constant 0 : index
    %24 = vector.load %arg4[%c2_20, %c0_21, %c0_22] : memref<9x128x128xbf16, #tpu.memory_space<vmem>>, vector<1x128x128xbf16>
    %25 = vector.shape_cast %24 : vector<1x128x128xbf16> to vector<128x128xbf16>
    %cst_23 = arith.constant dense<0.000000e+00> : vector<96x128xf32>
    %26 = tpu.matmul %23, %25, %cst_23 {dimension_numbers = #tpu.dot_dimension_numbers<[1], [0], [0], [1], [0, 0, 1, 1], [], []>} : vector<96x128xbf16>, vector<128x128xbf16>, vector<96x128xf32> -> vector<96x128xf32>
    %c0_24 = arith.constant 0 : index
    %c0_25 = arith.constant 0 : index
    %27 = vector.load %arg11[%c0_24, %c0_25] : memref<96x128xf32, #tpu.memory_space<vmem>>, vector<96x128xf32>
    %28 = arith.addf %27, %26 : vector<96x128xf32>
    %c0_26 = arith.constant 0 : index
    %c0_27 = arith.constant 0 : index
    %29 = vector.load %arg11[%c0_26, %c0_27] : memref<96x128xf32, #tpu.memory_space<vmem>>, vector<96x128xf32>
    tpu.vector_store %arg11[%c0_26, %c0_27], %28 {strides = array<i32>} : memref<96x128xf32, #tpu.memory_space<vmem>>, vector<96x128xf32>,
    %30 = vector.extract_strided_slice %5 {offsets = [1, 0, 0], sizes = [6, 16, 128], strides = [1, 1, 1]} : vector<8x16x128xbf16> to vector<6x16x128xbf16>
    %31 = vector.shape_cast %30 : vector<6x16x128xbf16> to vector<96x128xbf16>
    %c3 = arith.constant 3 : index
    %c0_28 = arith.constant 0 : index
    %c0_29 = arith.constant 0 : index
    %32 = vector.load %arg4[%c3, %c0_28, %c0_29] : memref<9x128x128xbf16, #tpu.memory_space<vmem>>, vector<1x128x128xbf16>
    %33 = vector.shape_cast %32 : vector<1x128x128xbf16> to vector<128x128xbf16>
    %cst_30 = arith.constant dense<0.000000e+00> : vector<96x128xf32>
    %34 = tpu.matmul %31, %33, %cst_30 {dimension_numbers = #tpu.dot_dimension_numbers<[1], [0], [0], [1], [0, 0, 1, 1], [], []>} : vector<96x128xbf16>, vector<128x128xbf16>, vector<96x128xf32> -> vector<96x128xf32>
    %c0_31 = arith.constant 0 : index
    %c0_32 = arith.constant 0 : index
    %35 = vector.load %arg11[%c0_31, %c0_32] : memref<96x128xf32, #tpu.memory_space<vmem>>, vector<96x128xf32>
    %36 = arith.addf %35, %34 : vector<96x128xf32>
    %c0_33 = arith.constant 0 : index
    %c0_34 = arith.constant 0 : index
    %37 = vector.load %arg11[%c0_33, %c0_34] : memref<96x128xf32, #tpu.memory_space<vmem>>, vector<96x128xf32>
    tpu.vector_store %arg11[%c0_33, %c0_34], %36 {strides = array<i32>} : memref<96x128xf32, #tpu.memory_space<vmem>>, vector<96x128xf32>,
    %38 = vector.extract_strided_slice %6 {offsets = [1, 0, 0], sizes = [6, 16, 128], strides = [1, 1, 1]} : vector<8x16x128xbf16> to vector<6x16x128xbf16>
    %39 = vector.shape_cast %38 : vector<6x16x128xbf16> to vector<96x128xbf16>
    %c4 = arith.constant 4 : index
    %c0_35 = arith.constant 0 : index
    %c0_36 = arith.constant 0 : index
    %40 = vector.load %arg4[%c4, %c0_35, %c0_36] : memref<9x128x128xbf16, #tpu.memory_space<vmem>>, vector<1x128x128xbf16>
    %41 = vector.shape_cast %40 : vector<1x128x128xbf16> to vector<128x128xbf16>
    %cst_37 = arith.constant dense<0.000000e+00> : vector<96x128xf32>
    %42 = tpu.matmul %39, %41, %cst_37 {dimension_numbers = #tpu.dot_dimension_numbers<[1], [0], [0], [1], [0, 0, 1, 1], [], []>} : vector<96x128xbf16>, vector<128x128xbf16>, vector<96x128xf32> -> vector<96x128xf32>
    %c0_38 = arith.constant 0 : index
    %c0_39 = arith.constant 0 : index
    %43 = vector.load %arg11[%c0_38, %c0_39] : memref<96x128xf32, #tpu.memory_space<vmem>>, vector<96x128xf32>
    %44 = arith.addf %43, %42 : vector<96x128xf32>
    %c0_40 = arith.constant 0 : index
    %c0_41 = arith.constant 0 : index
    %45 = vector.load %arg11[%c0_40, %c0_41] : memref<96x128xf32, #tpu.memory_space<vmem>>, vector<96x128xf32>
    tpu.vector_store %arg11[%c0_40, %c0_41], %44 {strides = array<i32>} : memref<96x128xf32, #tpu.memory_space<vmem>>, vector<96x128xf32>,
    %46 = vector.extract_strided_slice %7 {offsets = [1, 0, 0], sizes = [6, 16, 128], strides = [1, 1, 1]} : vector<8x16x128xbf16> to vector<6x16x128xbf16>
    %47 = vector.shape_cast %46 : vector<6x16x128xbf16> to vector<96x128xbf16>
    %c5 = arith.constant 5 : index
    %c0_42 = arith.constant 0 : index
    %c0_43 = arith.constant 0 : index
    %48 = vector.load %arg4[%c5, %c0_42, %c0_43] : memref<9x128x128xbf16, #tpu.memory_space<vmem>>, vector<1x128x128xbf16>
    %49 = vector.shape_cast %48 : vector<1x128x128xbf16> to vector<128x128xbf16>
    %cst_44 = arith.constant dense<0.000000e+00> : vector<96x128xf32>
    %50 = tpu.matmul %47, %49, %cst_44 {dimension_numbers = #tpu.dot_dimension_numbers<[1], [0], [0], [1], [0, 0, 1, 1], [], []>} : vector<96x128xbf16>, vector<128x128xbf16>, vector<96x128xf32> -> vector<96x128xf32>
    %c0_45 = arith.constant 0 : index
    %c0_46 = arith.constant 0 : index
    %51 = vector.load %arg11[%c0_45, %c0_46] : memref<96x128xf32, #tpu.memory_space<vmem>>, vector<96x128xf32>
    %52 = arith.addf %51, %50 : vector<96x128xf32>
    %c0_47 = arith.constant 0 : index
    %c0_48 = arith.constant 0 : index
    %53 = vector.load %arg11[%c0_47, %c0_48] : memref<96x128xf32, #tpu.memory_space<vmem>>, vector<96x128xf32>
    tpu.vector_store %arg11[%c0_47, %c0_48], %52 {strides = array<i32>} : memref<96x128xf32, #tpu.memory_space<vmem>>, vector<96x128xf32>,
    %54 = vector.extract_strided_slice %5 {offsets = [2, 0, 0], sizes = [6, 16, 128], strides = [1, 1, 1]} : vector<8x16x128xbf16> to vector<6x16x128xbf16>
    %55 = vector.shape_cast %54 : vector<6x16x128xbf16> to vector<96x128xbf16>
    %c6 = arith.constant 6 : index
    %c0_49 = arith.constant 0 : index
    %c0_50 = arith.constant 0 : index
    %56 = vector.load %arg4[%c6, %c0_49, %c0_50] : memref<9x128x128xbf16, #tpu.memory_space<vmem>>, vector<1x128x128xbf16>
    %57 = vector.shape_cast %56 : vector<1x128x128xbf16> to vector<128x128xbf16>
    %cst_51 = arith.constant dense<0.000000e+00> : vector<96x128xf32>
    %58 = tpu.matmul %55, %57, %cst_51 {dimension_numbers = #tpu.dot_dimension_numbers<[1], [0], [0], [1], [0, 0, 1, 1], [], []>} : vector<96x128xbf16>, vector<128x128xbf16>, vector<96x128xf32> -> vector<96x128xf32>
    %c0_52 = arith.constant 0 : index
    %c0_53 = arith.constant 0 : index
    %59 = vector.load %arg11[%c0_52, %c0_53] : memref<96x128xf32, #tpu.memory_space<vmem>>, vector<96x128xf32>
    %60 = arith.addf %59, %58 : vector<96x128xf32>
    %c0_54 = arith.constant 0 : index
    %c0_55 = arith.constant 0 : index
    %61 = vector.load %arg11[%c0_54, %c0_55] : memref<96x128xf32, #tpu.memory_space<vmem>>, vector<96x128xf32>
    tpu.vector_store %arg11[%c0_54, %c0_55], %60 {strides = array<i32>} : memref<96x128xf32, #tpu.memory_space<vmem>>, vector<96x128xf32>,
    %62 = vector.extract_strided_slice %6 {offsets = [2, 0, 0], sizes = [6, 16, 128], strides = [1, 1, 1]} : vector<8x16x128xbf16> to vector<6x16x128xbf16>
    %63 = vector.shape_cast %62 : vector<6x16x128xbf16> to vector<96x128xbf16>
    %c7 = arith.constant 7 : index
    %c0_56 = arith.constant 0 : index
    %c0_57 = arith.constant 0 : index
    %64 = vector.load %arg4[%c7, %c0_56, %c0_57] : memref<9x128x128xbf16, #tpu.memory_space<vmem>>, vector<1x128x128xbf16>
    %65 = vector.shape_cast %64 : vector<1x128x128xbf16> to vector<128x128xbf16>
    %cst_58 = arith.constant dense<0.000000e+00> : vector<96x128xf32>
    %66 = tpu.matmul %63, %65, %cst_58 {dimension_numbers = #tpu.dot_dimension_numbers<[1], [0], [0], [1], [0, 0, 1, 1], [], []>} : vector<96x128xbf16>, vector<128x128xbf16>, vector<96x128xf32> -> vector<96x128xf32>
    %c0_59 = arith.constant 0 : index
    %c0_60 = arith.constant 0 : index
    %67 = vector.load %arg11[%c0_59, %c0_60] : memref<96x128xf32, #tpu.memory_space<vmem>>, vector<96x128xf32>
    %68 = arith.addf %67, %66 : vector<96x128xf32>
    %c0_61 = arith.constant 0 : index
    %c0_62 = arith.constant 0 : index
    %69 = vector.load %arg11[%c0_61, %c0_62] : memref<96x128xf32, #tpu.memory_space<vmem>>, vector<96x128xf32>
    tpu.vector_store %arg11[%c0_61, %c0_62], %68 {strides = array<i32>} : memref<96x128xf32, #tpu.memory_space<vmem>>, vector<96x128xf32>,
    %70 = vector.extract_strided_slice %7 {offsets = [2, 0, 0], sizes = [6, 16, 128], strides = [1, 1, 1]} : vector<8x16x128xbf16> to vector<6x16x128xbf16>
    %71 = vector.shape_cast %70 : vector<6x16x128xbf16> to vector<96x128xbf16>
    %c8 = arith.constant 8 : index
    %c0_63 = arith.constant 0 : index
    %c0_64 = arith.constant 0 : index
    %72 = vector.load %arg4[%c8, %c0_63, %c0_64] : memref<9x128x128xbf16, #tpu.memory_space<vmem>>, vector<1x128x128xbf16>
    %73 = vector.shape_cast %72 : vector<1x128x128xbf16> to vector<128x128xbf16>
    %cst_65 = arith.constant dense<0.000000e+00> : vector<96x128xf32>
    %74 = tpu.matmul %71, %73, %cst_65 {dimension_numbers = #tpu.dot_dimension_numbers<[1], [0], [0], [1], [0, 0, 1, 1], [], []>} : vector<96x128xbf16>, vector<128x128xbf16>, vector<96x128xf32> -> vector<96x128xf32>
    %c0_66 = arith.constant 0 : index
    %c0_67 = arith.constant 0 : index
    %75 = vector.load %arg11[%c0_66, %c0_67] : memref<96x128xf32, #tpu.memory_space<vmem>>, vector<96x128xf32>
    %76 = arith.addf %75, %74 : vector<96x128xf32>
    %c0_68 = arith.constant 0 : index
    %c0_69 = arith.constant 0 : index
    %77 = vector.load %arg11[%c0_68, %c0_69] : memref<96x128xf32, #tpu.memory_space<vmem>>, vector<96x128xf32>
    tpu.vector_store %arg11[%c0_68, %c0_69], %76 {strides = array<i32>} : memref<96x128xf32, #tpu.memory_space<vmem>>, vector<96x128xf32>,
    %c0_70 = arith.constant 0 : index
    %c0_71 = arith.constant 0 : index
    %78 = vector.load %arg11[%c0_70, %c0_71] : memref<96x128xf32, #tpu.memory_space<vmem>>, vector<96x128xf32>
    %79 = vector.shape_cast %78 : vector<96x128xf32> to vector<6x16x128xf32>
    %c0_72 = arith.constant 0 : index
    %c0_73 = arith.constant 0 : index
    %80 = vector.load %arg5[%c0_72, %c0_73] : memref<1x128xf32, #tpu.memory_space<vmem>>, vector<1x128xf32>
    %81 = vector.shape_cast %80 : vector<1x128xf32> to vector<1x1x128xf32>
    %82 = vector.broadcast %81 : vector<1x1x128xf32> to vector<6x16x128xf32>
    %83 = arith.mulf %79, %82 : vector<6x16x128xf32>
    %c0_74 = arith.constant 0 : index
    %c0_75 = arith.constant 0 : index
    %84 = vector.load %arg6[%c0_74, %c0_75] : memref<1x128xf32, #tpu.memory_space<vmem>>, vector<1x128xf32>
    %85 = vector.shape_cast %84 : vector<1x128xf32> to vector<1x1x128xf32>
    %86 = vector.broadcast %85 : vector<1x1x128xf32> to vector<6x16x128xf32>
    %87 = arith.addf %83, %86 : vector<6x16x128xf32>
    %cst_76 = arith.constant 0.000000e+00 : f32
    %88 = vector.broadcast %cst_76 : f32 to vector<6x16x128xf32>
    %89 = arith.maximumf %87, %88 : vector<6x16x128xf32>
    %90 = tpu.iota {dimensions = array<i32: 0>} : vector<6x1x1xi32>
    %c0_i32 = arith.constant 0 : i32
    %91 = vector.broadcast %c0_i32 : i32 to vector<6x1x1xi32>
    %92 = arith.cmpi eq, %90, %91 : vector<6x1x1xi32>
    %c0_i32_77 = arith.constant 0 : i32
    %93 = arith.cmpi eq, %arg1, %c0_i32_77 : i32
    %94 = vector.broadcast %93 : i1 to vector<6x1x1xi1>
    %95 = arith.andi %92, %94 : vector<6x1x1xi1>
    %c5_i32 = arith.constant 5 : i32
    %96 = vector.broadcast %c5_i32 : i32 to vector<6x1x1xi32>
    %97 = arith.cmpi eq, %90, %96 : vector<6x1x1xi32>
    %c3_i32 = arith.constant 3 : i32
    %98 = arith.cmpi eq, %arg1, %c3_i32 : i32
    %99 = vector.broadcast %98 : i1 to vector<6x1x1xi1>
    %100 = arith.andi %97, %99 : vector<6x1x1xi1>
    %101 = arith.ori %95, %100 : vector<6x1x1xi1>
    %cst_78 = arith.constant 0.000000e+00 : f32
    %102 = vector.shape_cast %101 : vector<6x1x1xi1> to vector<6x1x1xi1>
    %103 = vector.broadcast %102 : vector<6x1x1xi1> to vector<6x16x128xi1>
    %104 = vector.broadcast %cst_78 : f32 to vector<6x16x128xf32>
    %105 = arith.select %103, %104, %89 : vector<6x16x128xi1>, vector<6x16x128xf32>
    %106 = arith.truncf %105 : vector<6x16x128xf32> to vector<6x16x128xbf16>
    %cst_79 = arith.constant 0.000000e+00 : bf16
    %107 = vector.broadcast %cst_79 : bf16 to vector<6x1x128xbf16>
    %cst_80 = arith.constant 0.000000e+00 : bf16
    %108 = vector.broadcast %cst_80 : bf16 to vector<6x7x128xbf16>
    %109 = tpu.concatenate %107, %106, %108 in 1 : vector<6x1x128xbf16>, vector<6x16x128xbf16>, vector<6x7x128xbf16> -> vector<6x24x128xbf16>
    %110 = vector.extract_strided_slice %109 {offsets = [0, 0, 0], sizes = [6, 16, 128], strides = [1, 1, 1]} : vector<6x24x128xbf16> to vector<6x16x128xbf16>
    %111 = vector.extract_strided_slice %109 {offsets = [0, 1, 0], sizes = [6, 16, 128], strides = [1, 1, 1]} : vector<6x24x128xbf16> to vector<6x16x128xbf16>
    %112 = vector.extract_strided_slice %109 {offsets = [0, 2, 0], sizes = [6, 16, 128], strides = [1, 1, 1]} : vector<6x24x128xbf16> to vector<6x16x128xbf16>
    %113 = vector.extract_strided_slice %110 {offsets = [0, 0, 0], sizes = [4, 16, 128], strides = [1, 1, 1]} : vector<6x16x128xbf16> to vector<4x16x128xbf16>
    %114 = vector.shape_cast %113 : vector<4x16x128xbf16> to vector<64x128xbf16>
    %c0_81 = arith.constant 0 : index
    %c0_82 = arith.constant 0 : index
    %c0_83 = arith.constant 0 : index
    %115 = vector.load %arg7[%c0_81, %c0_82, %c0_83] : memref<9x128x128xbf16, #tpu.memory_space<vmem>>, vector<1x128x128xbf16>
    %116 = vector.shape_cast %115 : vector<1x128x128xbf16> to vector<128x128xbf16>
    %cst_84 = arith.constant dense<0.000000e+00> : vector<64x128xf32>
    %117 = tpu.matmul %114, %116, %cst_84 {dimension_numbers = #tpu.dot_dimension_numbers<[1], [0], [0], [1], [0, 0, 1, 1], [], []>} : vector<64x128xbf16>, vector<128x128xbf16>, vector<64x128xf32> -> vector<64x128xf32>
    %c0_85 = arith.constant 0 : index
    %c0_86 = arith.constant 0 : index
    %118 = vector.load %arg12[%c0_85, %c0_86] : memref<64x128xf32, #tpu.memory_space<vmem>>, vector<64x128xf32>
    tpu.vector_store %arg12[%c0_85, %c0_86], %117 {strides = array<i32>} : memref<64x128xf32, #tpu.memory_space<vmem>>, vector<64x128xf32>,
    %119 = vector.extract_strided_slice %111 {offsets = [0, 0, 0], sizes = [4, 16, 128], strides = [1, 1, 1]} : vector<6x16x128xbf16> to vector<4x16x128xbf16>
    %120 = vector.shape_cast %119 : vector<4x16x128xbf16> to vector<64x128xbf16>
    %c1_87 = arith.constant 1 : index
    %c0_88 = arith.constant 0 : index
    %c0_89 = arith.constant 0 : index
    %121 = vector.load %arg7[%c1_87, %c0_88, %c0_89] : memref<9x128x128xbf16, #tpu.memory_space<vmem>>, vector<1x128x128xbf16>
    %122 = vector.shape_cast %121 : vector<1x128x128xbf16> to vector<128x128xbf16>
    %cst_90 = arith.constant dense<0.000000e+00> : vector<64x128xf32>
    %123 = tpu.matmul %120, %122, %cst_90 {dimension_numbers = #tpu.dot_dimension_numbers<[1], [0], [0], [1], [0, 0, 1, 1], [], []>} : vector<64x128xbf16>, vector<128x128xbf16>, vector<64x128xf32> -> vector<64x128xf32>
    %c0_91 = arith.constant 0 : index
    %c0_92 = arith.constant 0 : index
    %124 = vector.load %arg12[%c0_91, %c0_92] : memref<64x128xf32, #tpu.memory_space<vmem>>, vector<64x128xf32>
    %125 = arith.addf %124, %123 : vector<64x128xf32>
    %c0_93 = arith.constant 0 : index
    %c0_94 = arith.constant 0 : index
    %126 = vector.load %arg12[%c0_93, %c0_94] : memref<64x128xf32, #tpu.memory_space<vmem>>, vector<64x128xf32>
    tpu.vector_store %arg12[%c0_93, %c0_94], %125 {strides = array<i32>} : memref<64x128xf32, #tpu.memory_space<vmem>>, vector<64x128xf32>,
    %127 = vector.extract_strided_slice %112 {offsets = [0, 0, 0], sizes = [4, 16, 128], strides = [1, 1, 1]} : vector<6x16x128xbf16> to vector<4x16x128xbf16>
    %128 = vector.shape_cast %127 : vector<4x16x128xbf16> to vector<64x128xbf16>
    %c2_95 = arith.constant 2 : index
    %c0_96 = arith.constant 0 : index
    %c0_97 = arith.constant 0 : index
    %129 = vector.load %arg7[%c2_95, %c0_96, %c0_97] : memref<9x128x128xbf16, #tpu.memory_space<vmem>>, vector<1x128x128xbf16>
    %130 = vector.shape_cast %129 : vector<1x128x128xbf16> to vector<128x128xbf16>
    %cst_98 = arith.constant dense<0.000000e+00> : vector<64x128xf32>
    %131 = tpu.matmul %128, %130, %cst_98 {dimension_numbers = #tpu.dot_dimension_numbers<[1], [0], [0], [1], [0, 0, 1, 1], [], []>} : vector<64x128xbf16>, vector<128x128xbf16>, vector<64x128xf32> -> vector<64x128xf32>
    %c0_99 = arith.constant 0 : index
    %c0_100 = arith.constant 0 : index
    %132 = vector.load %arg12[%c0_99, %c0_100] : memref<64x128xf32, #tpu.memory_space<vmem>>, vector<64x128xf32>
    %133 = arith.addf %132, %131 : vector<64x128xf32>
    %c0_101 = arith.constant 0 : index
    %c0_102 = arith.constant 0 : index
    %134 = vector.load %arg12[%c0_101, %c0_102] : memref<64x128xf32, #tpu.memory_space<vmem>>, vector<64x128xf32>
    tpu.vector_store %arg12[%c0_101, %c0_102], %133 {strides = array<i32>} : memref<64x128xf32, #tpu.memory_space<vmem>>, vector<64x128xf32>,
    %135 = vector.extract_strided_slice %110 {offsets = [1, 0, 0], sizes = [4, 16, 128], strides = [1, 1, 1]} : vector<6x16x128xbf16> to vector<4x16x128xbf16>
    %136 = vector.shape_cast %135 : vector<4x16x128xbf16> to vector<64x128xbf16>
    %c3_103 = arith.constant 3 : index
    %c0_104 = arith.constant 0 : index
    %c0_105 = arith.constant 0 : index
    %137 = vector.load %arg7[%c3_103, %c0_104, %c0_105] : memref<9x128x128xbf16, #tpu.memory_space<vmem>>, vector<1x128x128xbf16>
    %138 = vector.shape_cast %137 : vector<1x128x128xbf16> to vector<128x128xbf16>
    %cst_106 = arith.constant dense<0.000000e+00> : vector<64x128xf32>
    %139 = tpu.matmul %136, %138, %cst_106 {dimension_numbers = #tpu.dot_dimension_numbers<[1], [0], [0], [1], [0, 0, 1, 1], [], []>} : vector<64x128xbf16>, vector<128x128xbf16>, vector<64x128xf32> -> vector<64x128xf32>
    %c0_107 = arith.constant 0 : index
    %c0_108 = arith.constant 0 : index
    %140 = vector.load %arg12[%c0_107, %c0_108] : memref<64x128xf32, #tpu.memory_space<vmem>>, vector<64x128xf32>
    %141 = arith.addf %140, %139 : vector<64x128xf32>
    %c0_109 = arith.constant 0 : index
    %c0_110 = arith.constant 0 : index
    %142 = vector.load %arg12[%c0_109, %c0_110] : memref<64x128xf32, #tpu.memory_space<vmem>>, vector<64x128xf32>
    tpu.vector_store %arg12[%c0_109, %c0_110], %141 {strides = array<i32>} : memref<64x128xf32, #tpu.memory_space<vmem>>, vector<64x128xf32>,
    %143 = vector.extract_strided_slice %111 {offsets = [1, 0, 0], sizes = [4, 16, 128], strides = [1, 1, 1]} : vector<6x16x128xbf16> to vector<4x16x128xbf16>
    %144 = vector.shape_cast %143 : vector<4x16x128xbf16> to vector<64x128xbf16>
    %c4_111 = arith.constant 4 : index
    %c0_112 = arith.constant 0 : index
    %c0_113 = arith.constant 0 : index
    %145 = vector.load %arg7[%c4_111, %c0_112, %c0_113] : memref<9x128x128xbf16, #tpu.memory_space<vmem>>, vector<1x128x128xbf16>
    %146 = vector.shape_cast %145 : vector<1x128x128xbf16> to vector<128x128xbf16>
    %cst_114 = arith.constant dense<0.000000e+00> : vector<64x128xf32>
    %147 = tpu.matmul %144, %146, %cst_114 {dimension_numbers = #tpu.dot_dimension_numbers<[1], [0], [0], [1], [0, 0, 1, 1], [], []>} : vector<64x128xbf16>, vector<128x128xbf16>, vector<64x128xf32> -> vector<64x128xf32>
    %c0_115 = arith.constant 0 : index
    %c0_116 = arith.constant 0 : index
    %148 = vector.load %arg12[%c0_115, %c0_116] : memref<64x128xf32, #tpu.memory_space<vmem>>, vector<64x128xf32>
    %149 = arith.addf %148, %147 : vector<64x128xf32>
    %c0_117 = arith.constant 0 : index
    %c0_118 = arith.constant 0 : index
    %150 = vector.load %arg12[%c0_117, %c0_118] : memref<64x128xf32, #tpu.memory_space<vmem>>, vector<64x128xf32>
    tpu.vector_store %arg12[%c0_117, %c0_118], %149 {strides = array<i32>} : memref<64x128xf32, #tpu.memory_space<vmem>>, vector<64x128xf32>,
    %151 = vector.extract_strided_slice %112 {offsets = [1, 0, 0], sizes = [4, 16, 128], strides = [1, 1, 1]} : vector<6x16x128xbf16> to vector<4x16x128xbf16>
    %152 = vector.shape_cast %151 : vector<4x16x128xbf16> to vector<64x128xbf16>
    %c5_119 = arith.constant 5 : index
    %c0_120 = arith.constant 0 : index
    %c0_121 = arith.constant 0 : index
    %153 = vector.load %arg7[%c5_119, %c0_120, %c0_121] : memref<9x128x128xbf16, #tpu.memory_space<vmem>>, vector<1x128x128xbf16>
    %154 = vector.shape_cast %153 : vector<1x128x128xbf16> to vector<128x128xbf16>
    %cst_122 = arith.constant dense<0.000000e+00> : vector<64x128xf32>
    %155 = tpu.matmul %152, %154, %cst_122 {dimension_numbers = #tpu.dot_dimension_numbers<[1], [0], [0], [1], [0, 0, 1, 1], [], []>} : vector<64x128xbf16>, vector<128x128xbf16>, vector<64x128xf32> -> vector<64x128xf32>
    %c0_123 = arith.constant 0 : index
    %c0_124 = arith.constant 0 : index
    %156 = vector.load %arg12[%c0_123, %c0_124] : memref<64x128xf32, #tpu.memory_space<vmem>>, vector<64x128xf32>
    %157 = arith.addf %156, %155 : vector<64x128xf32>
    %c0_125 = arith.constant 0 : index
    %c0_126 = arith.constant 0 : index
    %158 = vector.load %arg12[%c0_125, %c0_126] : memref<64x128xf32, #tpu.memory_space<vmem>>, vector<64x128xf32>
    tpu.vector_store %arg12[%c0_125, %c0_126], %157 {strides = array<i32>} : memref<64x128xf32, #tpu.memory_space<vmem>>, vector<64x128xf32>,
    %159 = vector.extract_strided_slice %110 {offsets = [2, 0, 0], sizes = [4, 16, 128], strides = [1, 1, 1]} : vector<6x16x128xbf16> to vector<4x16x128xbf16>
    %160 = vector.shape_cast %159 : vector<4x16x128xbf16> to vector<64x128xbf16>
    %c6_127 = arith.constant 6 : index
    %c0_128 = arith.constant 0 : index
    %c0_129 = arith.constant 0 : index
    %161 = vector.load %arg7[%c6_127, %c0_128, %c0_129] : memref<9x128x128xbf16, #tpu.memory_space<vmem>>, vector<1x128x128xbf16>
    %162 = vector.shape_cast %161 : vector<1x128x128xbf16> to vector<128x128xbf16>
    %cst_130 = arith.constant dense<0.000000e+00> : vector<64x128xf32>
    %163 = tpu.matmul %160, %162, %cst_130 {dimension_numbers = #tpu.dot_dimension_numbers<[1], [0], [0], [1], [0, 0, 1, 1], [], []>} : vector<64x128xbf16>, vector<128x128xbf16>, vector<64x128xf32> -> vector<64x128xf32>
    %c0_131 = arith.constant 0 : index
    %c0_132 = arith.constant 0 : index
    %164 = vector.load %arg12[%c0_131, %c0_132] : memref<64x128xf32, #tpu.memory_space<vmem>>, vector<64x128xf32>
    %165 = arith.addf %164, %163 : vector<64x128xf32>
    %c0_133 = arith.constant 0 : index
    %c0_134 = arith.constant 0 : index
    %166 = vector.load %arg12[%c0_133, %c0_134] : memref<64x128xf32, #tpu.memory_space<vmem>>, vector<64x128xf32>
    tpu.vector_store %arg12[%c0_133, %c0_134], %165 {strides = array<i32>} : memref<64x128xf32, #tpu.memory_space<vmem>>, vector<64x128xf32>,
    %167 = vector.extract_strided_slice %111 {offsets = [2, 0, 0], sizes = [4, 16, 128], strides = [1, 1, 1]} : vector<6x16x128xbf16> to vector<4x16x128xbf16>
    %168 = vector.shape_cast %167 : vector<4x16x128xbf16> to vector<64x128xbf16>
    %c7_135 = arith.constant 7 : index
    %c0_136 = arith.constant 0 : index
    %c0_137 = arith.constant 0 : index
    %169 = vector.load %arg7[%c7_135, %c0_136, %c0_137] : memref<9x128x128xbf16, #tpu.memory_space<vmem>>, vector<1x128x128xbf16>
    %170 = vector.shape_cast %169 : vector<1x128x128xbf16> to vector<128x128xbf16>
    %cst_138 = arith.constant dense<0.000000e+00> : vector<64x128xf32>
    %171 = tpu.matmul %168, %170, %cst_138 {dimension_numbers = #tpu.dot_dimension_numbers<[1], [0], [0], [1], [0, 0, 1, 1], [], []>} : vector<64x128xbf16>, vector<128x128xbf16>, vector<64x128xf32> -> vector<64x128xf32>
    %c0_139 = arith.constant 0 : index
    %c0_140 = arith.constant 0 : index
    %172 = vector.load %arg12[%c0_139, %c0_140] : memref<64x128xf32, #tpu.memory_space<vmem>>, vector<64x128xf32>
    %173 = arith.addf %172, %171 : vector<64x128xf32>
    %c0_141 = arith.constant 0 : index
    %c0_142 = arith.constant 0 : index
    %174 = vector.load %arg12[%c0_141, %c0_142] : memref<64x128xf32, #tpu.memory_space<vmem>>, vector<64x128xf32>
    tpu.vector_store %arg12[%c0_141, %c0_142], %173 {strides = array<i32>} : memref<64x128xf32, #tpu.memory_space<vmem>>, vector<64x128xf32>,
    %175 = vector.extract_strided_slice %112 {offsets = [2, 0, 0], sizes = [4, 16, 128], strides = [1, 1, 1]} : vector<6x16x128xbf16> to vector<4x16x128xbf16>
    %176 = vector.shape_cast %175 : vector<4x16x128xbf16> to vector<64x128xbf16>
    %c8_143 = arith.constant 8 : index
    %c0_144 = arith.constant 0 : index
    %c0_145 = arith.constant 0 : index
    %177 = vector.load %arg7[%c8_143, %c0_144, %c0_145] : memref<9x128x128xbf16, #tpu.memory_space<vmem>>, vector<1x128x128xbf16>
    %178 = vector.shape_cast %177 : vector<1x128x128xbf16> to vector<128x128xbf16>
    %cst_146 = arith.constant dense<0.000000e+00> : vector<64x128xf32>
    %179 = tpu.matmul %176, %178, %cst_146 {dimension_numbers = #tpu.dot_dimension_numbers<[1], [0], [0], [1], [0, 0, 1, 1], [], []>} : vector<64x128xbf16>, vector<128x128xbf16>, vector<64x128xf32> -> vector<64x128xf32>
    %c0_147 = arith.constant 0 : index
    %c0_148 = arith.constant 0 : index
    %180 = vector.load %arg12[%c0_147, %c0_148] : memref<64x128xf32, #tpu.memory_space<vmem>>, vector<64x128xf32>
    %181 = arith.addf %180, %179 : vector<64x128xf32>
    %c0_149 = arith.constant 0 : index
    %c0_150 = arith.constant 0 : index
    %182 = vector.load %arg12[%c0_149, %c0_150] : memref<64x128xf32, #tpu.memory_space<vmem>>, vector<64x128xf32>
    tpu.vector_store %arg12[%c0_149, %c0_150], %181 {strides = array<i32>} : memref<64x128xf32, #tpu.memory_space<vmem>>, vector<64x128xf32>,
    %c0_151 = arith.constant 0 : index
    %c0_152 = arith.constant 0 : index
    %183 = vector.load %arg12[%c0_151, %c0_152] : memref<64x128xf32, #tpu.memory_space<vmem>>, vector<64x128xf32>
    %184 = vector.shape_cast %183 : vector<64x128xf32> to vector<4x16x128xf32>
    %c0_153 = arith.constant 0 : index
    %c0_154 = arith.constant 0 : index
    %185 = vector.load %arg8[%c0_153, %c0_154] : memref<1x128xf32, #tpu.memory_space<vmem>>, vector<1x128xf32>
    %186 = vector.shape_cast %185 : vector<1x128xf32> to vector<1x1x128xf32>
    %187 = vector.broadcast %186 : vector<1x1x128xf32> to vector<4x16x128xf32>
    %188 = arith.mulf %184, %187 : vector<4x16x128xf32>
    %c0_155 = arith.constant 0 : index
    %c0_156 = arith.constant 0 : index
    %189 = vector.load %arg9[%c0_155, %c0_156] : memref<1x128xf32, #tpu.memory_space<vmem>>, vector<1x128xf32>
    %190 = vector.shape_cast %189 : vector<1x128xf32> to vector<1x1x128xf32>
    %191 = vector.broadcast %190 : vector<1x1x128xf32> to vector<4x16x128xf32>
    %192 = arith.addf %188, %191 : vector<4x16x128xf32>
    %cst_157 = arith.constant 0.000000e+00 : f32
    %193 = vector.broadcast %cst_157 : f32 to vector<4x16x128xf32>
    %194 = arith.maximumf %192, %193 : vector<4x16x128xf32>
    %c0_158 = arith.constant 0 : index
    %c0_159 = arith.constant 0 : index
    %c0_160 = arith.constant 0 : index
    %c0_161 = arith.constant 0 : index
    %195 = vector.load %arg10[%c0_158, %c0_159, %c0_160, %c0_161] : memref<1x4x16x128xf32, #tpu.memory_space<vmem>>, vector<1x4x16x128xf32>
    %196 = vector.shape_cast %195 : vector<1x4x16x128xf32> to vector<4x16x128xf32>
    %197 = vector.shape_cast %194 : vector<4x16x128xf32> to vector<1x4x16x128xf32>
    tpu.vector_store %arg10[%c0_158, %c0_159, %c0_160, %c0_161], %197 {strides = array<i32>} : memref<1x4x16x128xf32, #tpu.memory_space<vmem>>, vector<1x4x16x128xf32>,
    return
  }
  func.func @transform_0(%arg0: i32, %arg1: i32) -> (i32, i32, i32, i32) {
    %c0_i32 = arith.constant 0 : i32
    %c0_i32_0 = arith.constant 0 : i32
    %c0_i32_1 = arith.constant 0 : i32
    return %arg0, %arg1, %c0_i32, %c0_i32_0 : i32, i32, i32, i32
  }
  func.func @transform_1(%arg0: i32, %arg1: i32) -> (i32, i32, i32) {
    %c4_i32 = arith.constant 4 : i32
    %0 = arith.muli %arg0, %c4_i32 : i32
    %1 = arith.addi %0, %arg1 : i32
    %c0_i32 = arith.constant 0 : i32
    %c0_i32_0 = arith.constant 0 : i32
    %c0_i32_1 = arith.constant 0 : i32
    return %1, %c0_i32, %c0_i32_0 : i32, i32, i32
  }
  func.func @transform_2(%arg0: i32, %arg1: i32) -> (i32, i32, i32) {
    %c0_i32 = arith.constant 0 : i32
    %c0_i32_0 = arith.constant 0 : i32
    %c0_i32_1 = arith.constant 0 : i32
    %c0_i32_2 = arith.constant 0 : i32
    return %c0_i32, %c0_i32_0, %c0_i32_1 : i32, i32, i32
  }
  func.func @transform_3(%arg0: i32, %arg1: i32) -> (i32, i32) {
    %c0_i32 = arith.constant 0 : i32
    %c0_i32_0 = arith.constant 0 : i32
    %c0_i32_1 = arith.constant 0 : i32
    return %c0_i32, %c0_i32_0 : i32, i32
  }
  func.func @transform_4(%arg0: i32, %arg1: i32) -> (i32, i32) {
    %c0_i32 = arith.constant 0 : i32
    %c0_i32_0 = arith.constant 0 : i32
    %c0_i32_1 = arith.constant 0 : i32
    return %c0_i32, %c0_i32_0 : i32, i32
  }
  func.func @transform_5(%arg0: i32, %arg1: i32) -> (i32, i32, i32) {
    %c0_i32 = arith.constant 0 : i32
    %c0_i32_0 = arith.constant 0 : i32
    %c0_i32_1 = arith.constant 0 : i32
    %c0_i32_2 = arith.constant 0 : i32
    return %c0_i32, %c0_i32_0, %c0_i32_1 : i32, i32, i32
  }
  func.func @transform_6(%arg0: i32, %arg1: i32) -> (i32, i32) {
    %c0_i32 = arith.constant 0 : i32
    %c0_i32_0 = arith.constant 0 : i32
    %c0_i32_1 = arith.constant 0 : i32
    return %c0_i32, %c0_i32_0 : i32, i32
  }
  func.func @transform_7(%arg0: i32, %arg1: i32) -> (i32, i32) {
    %c0_i32 = arith.constant 0 : i32
    %c0_i32_0 = arith.constant 0 : i32
    %c0_i32_1 = arith.constant 0 : i32
    return %c0_i32, %c0_i32_0 : i32, i32
  }
  func.func @transform_8(%arg0: i32, %arg1: i32) -> (i32, i32, i32, i32) {
    %c0_i32 = arith.constant 0 : i32
    %c0_i32_0 = arith.constant 0 : i32
    %c0_i32_1 = arith.constant 0 : i32
    return %arg0, %arg1, %c0_i32, %c0_i32_0 : i32, i32, i32, i32
  }
}

</mosaic_0001>

<bundles_post_ra>
// kernel: _lambda_.1
= control target key start
LH: loop header
LB: loop body
LE: loop exit
PB: predicated region body
PF: predicated region fallthrough
CT: control target
= control target key end

     0   :  { %s5655_s27 = smov 0   ;;  %s5657_s28 = smov 0   ;;  %s6935_s0 = inlined_call_operand.vmem [shape: bf16[2,16,24,128], index: 0, kind: input, shape index: {}]   ;;  %s6936_s1 = inlined_call_operand.vmem [shape: bf16[32,24,128], index: 1, kind: input, shape index: {}]   ;;  %s6937_s2 = inlined_call_operand.vmem [shape: bf16[9,128,128], index: 2, kind: input, shape index: {}]   ;;  %s6938_s3 = inlined_call_operand.vmem [shape: f32[1,128], index: 3, kind: input, shape index: {}]   ;;  %s6939_s4 = inlined_call_operand.vmem [shape: f32[1,128], index: 4, kind: input, shape index: {}]   ;;  %s6940_s5 = inlined_call_operand.vmem [shape: bf16[9,128,128], index: 5, kind: input, shape index: {}]   ;;  %s6941_s6 = inlined_call_operand.vmem [shape: f32[1,128], index: 6, kind: input, shape index: {}]   ;;  %s6942_s7 = inlined_call_operand.vmem [shape: f32[1,128], index: 7, kind: input, shape index: {}]   ;;  %s6943_s8 = inlined_call_operand.vmem [shape: f32[2,16,16,128], index: 8, kind: output, shape index: {}]  }
   0x1   :  { %s5659_s29 = smov 0   ;;  %s5661_s30 = smov 0  }
   0x2   :  { %s5663_s9 = smov 0  }
   0x3 LB: > { %s27_s10 = sadd.s32 1, %s5600_s29  ;;  %s30_s11 = sadd.s32 1, %s5604_s30  ;;  %s5608_s9 = sphi %s5663_s9, %s18_s9   ;;  %s5604_s30 = sphi %s5661_s30, %s6981_s30   ;;  %s5600_s29 = sphi %s5659_s29, %s6980_s29   ;;  %s5596_s28 = sphi %s5657_s28, %s6979_s28   ;;  %s5592_s27 = sphi %s5655_s27, %s6978_s27  }
   0x4   : > { %p28_p0 = scmp.ge.s32.totalorder %s27_s10, 4  ;;  %p4219_p1 = scmp.ge.s32.totalorder %s5608_s9, 1 }
   0x5   : > { %p304_p2 = scmp.lt.s32.totalorder %s5608_s9, 9 }
   0x6   : > { %s6983_s10 = smov (%p28_p0, %s27_s10), 0  ;;  %s6985_s11 = smov (!%p28_p0, %s30_s11), %s5604_s30 }
   0x7   : > { %p305_p3 = pnand %p4219_p1, %p304_p2  ;;  %p32_p4 = scmp.ge.s32.totalorder %s6985_s11, 2 }
   0x9   : > { %s6987_s11 = smov (%p32_p4, %s6985_s11), 0  ;;  %308 = sbr.rel (%p305_p3) target bundleno = 737 (0x2e1), region = 52 }
   0xe   : > { %v5418_v0 = vld [vmem:[%s6937_s2 + $0x38] sm:$0xff]   ;;  %s4222_s14 = sshll.u32 %s5596_s28, 2  ;;  %v5420_v2 = vld [vmem:[%s6937_s2 + $0x30] sm:$0xff]   ;;  %v5422_v4 = vld [vmem:[%s6937_s2 + $0x28] sm:$0xff]   ;;  %s4220_s25 = sshll.u32 %s5592_s27, 2  ;;  %vm967_vm3 = vcmask 1042432  }
   0xf   : > { %v5419_v1 = vld [vmem:[%s6937_s2 + $0x78] sm:$0xff]   ;;  %s368_s17 = sadd.s32 %s5592_s27, %s4222_s14  ;;  %4907 = vmatprep.subr.bf16.mxu0 %v5418_v0  ;;  %v5421_v3 = vld [vmem:[%s6937_s2 + $0x70] sm:$0xff]   ;;  %v5423_v5 = vld [vmem:[%s6937_s2 + $0x68] sm:$0xff]   ;;  %p357_p6 = scmp.lt.s32.totalorder %s5596_s28, 1  ;;  %vm608_vm0 = vsmask.f32 3328 }
  0x10   : > { %s4223_s20 = sshll.u32 %s368_s17, 2  ;;  %4935 = vmatprep.subr.bf16.mxu1 %v5419_v1  ;;  %4908 = vmatpush3.bf16.msra.mxu0 %v5418_v0  ;;  %v5424_v6 = vld [vmem:[%s6937_s2 + $0x20] sm:$0xff]   ;;  %p359_p7 = scmp.lt.s32.totalorder %s4220_s25, 15  ;;  %v5426_v8 = vld [vmem:[%s6937_s2 + $0x18] sm:$0xff]   ;;  %v5428_v10 = vld [vmem:[%s6937_s2 + $0x10] sm:$0xff]   ;;  %vm968_vm4 = vcmask 1046532  }
  0x11   : > { %p370_p5 = scmp.lt.s32.totalorder %s4223_s20, 31  ;;  %4936 = vmatpush3.bf16.msra.mxu1 %v5419_v1  ;;  %4909 = vmatprep.subr.bf16.mxu0 %v5420_v2  ;;  %v5425_v7 = vld [vmem:[%s6937_s2 + $0x60] sm:$0xff]   ;;  %s6991_s28 = smov (!%p357_p6, %s5596_s28), 1  ;;  %v5427_v9 = vld [vmem:[%s6937_s2 + $0x58] sm:$0xff]   ;;  %v5429_v14 = vld [vmem:[%s6937_s2 + $0x50] sm:$0xff]   ;;  %vm2548_vm7 = vcmask 1040384  }
  0x12   : > { %4937 = vmatprep.subr.bf16.mxu1 %v5421_v3  ;;  %s6993_s25 = smov (!%p359_p7, %s4220_s25), 15  ;;  %s5376_s26 = smul.u32 48, %s6991_s28  ;;  %vm609_vm1 = vsmask.f32 7440  ;;  %v5430_v25 = vld [vmem:[%s6937_s2 + $0x8] sm:$0xff]   ;;  %v5432_v37 = vld [vmem:[%s6937_s2] sm:$0xff]   ;;  %vm5886_vm5 = vmor %vm967_vm3, %vm968_vm4 }
  0x13   : > { %s6989_s20 = smov (!%p370_p5, %s4223_s20), 31  ;;  %s5375_s14 = smul.u32 3, %s6993_s25  ;;  %v5431_v29 = vld [vmem:[%s6937_s2 + $0x48] sm:$0xff]   ;;  %vm5779_vm2 = vmor %vm608_vm0, %vm609_vm1  ;;  %v5433_v42 = vld [vmem:[%s6937_s2 + $0x40] sm:$0xff]   ;;  %vm2549_vm8 = vsmask.f32 256 }
  0x14   : > { %4910 = vmatpush3.bf16.msra.mxu0 %v5420_v2  ;;  %s5377_s17 = smul.u32 12, %s6989_s20  ;;  %v5436_v52 = vld [vmem:[%s6937_s2 + $0xb8] sm:$0xff]   ;;  %v5496_v34 = vld [vmem:[%s6937_s2 + $0x208] sm:$0xff]   ;;  %p2464_p8 = scmp.eq.s32.totalorder %s5592_s27, 0  ;;  %vm6505_vm10 = vmand %vm2548_vm7, %vm2549_vm8  ;;  %vm2700_vm11 = vsmask.f32 7424 }
  0x15   : > { %4938 = vmatpush3.bf16.msra.mxu1 %v5421_v3  ;;  %4911 = vmatprep.subr.bf16.mxu0 %v5422_v4  ;;  %v5437_v57 = vld [vmem:[%s6937_s2 + $0xf8] sm:$0xff]   ;;  %p2468_p9 = scmp.eq.s32.totalorder %s5592_s27, 3  ;;  %vm2915_vm12 = vcmask 1046528   ;;  %s4226_s20 = sshll.u32 %s6993_s25, 1 }
  0x16   : > { %4939 = vmatprep.subr.bf16.mxu1 %v5423_v5  ;;  %s5731_s24 = scalar_lea.vmem %s6936_s1, %s5377_s17  ;;  %s5762_s17 = sadd.s32 %s5376_s26, %s5375_s14 }
  0x17   : > { %v5739_v11 = vld [vmem:[%s5731_s24] sm:$0xf]  ;;  %v5742_v12 = vld [vmem:[%s5731_s24 + $0x4] sm:$0xf]  ;;  %v5745_v13 = vld [vmem:[%s5731_s24 + $0x8] sm:$0xf] }
  0x18   : > { %4912 = vmatpush3.bf16.msra.mxu0 %v5422_v4  ;;  %v4235_v15 = vcombine.low %v5739_v11, %v5742_v12  ;;  %v612_v16 = vshrl.u32 %v5739_v11, 16  ;;  %v615_v17 = vshll.u32 %v5739_v11, 16  ;;  %v625_v18 = vshrl.u32 %v5742_v12, 16  ;;  %v5756_v19 = vld [vmem:[%s5731_s24 + $0xc] sm:$0xf]  ;;  %s4221_s23 = sshll.u32 %s5762_s17, 2 }
  0x19   : > { %4940 = vmatpush3.bf16.msra.mxu1 %v5423_v5  ;;  %4913 = vmatprep.subr.bf16.mxu0 %v5424_v6  ;;  %v621_v22 = vshll.u32 %v5742_v12, 16  ;;  %v5760_v24 = vld [vmem:[%s5731_s24 + $0x10] sm:$0xf]  ;;  %v631_v26 = vshll.u32 %v5745_v13, 16  ;;  %v636_v27 = vshrl.u32 %v5756_v19, 16  ;;  %v639_v32 = vshll.u32 %v5756_v19, 16  ;;  %s5798_s16 = scalar_lea.vmem %s6935_s0, %s4221_s23 }
  0x1a   : > { %4941 = vmatprep.subr.bf16.mxu1 %v5425_v7  ;;  %4923 = vmatprep.mubr.bf16.mxu0 %v4235_v15  ;;  %v614_v20 = vrot.slane %v612_v16, 4  ;;  %v617_v21 = vrot.slane %v615_v17, 5  ;;  %v627_v23 = vrot.slane %v625_v18, 4  ;;  %v5770_v28 = vld [vmem:[%s5731_s24 + $0x14] sm:$0xf]  ;;  %v649_v33 = vshrl.u32 %v5760_v24, 16 }
  0x1b   : > { %v623_v31 = vrot.slane %v621_v22, 5  ;;  %v633_v35 = vrot.slane %v631_v26, 5  ;;  %v638_v36 = vrot.slane %v636_v27, 4  ;;  %v641_v40 = vrot.slane %v639_v32, 5  ;;  %v5811_v59 = vld [vmem:[%s5798_s16] sm:$0xf] }
  0x1c   : > { %4914 = vmatpush3.bf16.msra.mxu0 %v5424_v6  ;;  %v618_v30 = vor.u32 %v617_v21, %v614_v20  ;;  %v645_v41 = vshll.u32 %v5760_v24, 16  ;;  %v4279_v43 = vrot.slane %v5739_v11, 9  ;;  %v651_v44 = vrot.slane %v649_v33, 4  ;;  %v5814_v60 = vld [vmem:[%s5798_s16 + $0x4] sm:$0xf]  ;;  %v5438_v16 = vld [vmem:[%s6937_s2 + $0xb0] sm:$0xff]  }
  0x1d   : > { %4942 = vmatpush3.bf16.msra.mxu1 %v5425_v7  ;;  %4915 = vmatprep.subr.bf16.mxu0 %v5426_v8  ;;  %v628_v39 = vor.u32 %v627_v23, %v623_v31  ;;  %v655_v45 = vshll.u32 %v5770_v28, 16  ;;  %v642_v48 = vor.u32 %v641_v40, %v638_v36  ;;  %v972_v50 = vrot.slane %v5742_v12, 5  ;;  %v5817_v61 = vld [vmem:[%s5798_s16 + $0x8] sm:$0xf]  ;;  %v5831_v6 = vld [vmem:[%s5798_s16 + $0xc] sm:$0xf] }
  0x1e   : > { %4943 = vmatprep.subr.bf16.mxu1 %v5427_v9  ;;  %v619_v38 = vrot.slane %v618_v30, 4  ;;  %v647_v49 = vrot.slane %v645_v41, 5  ;;  %v975_v51 = vrot.slane %v5745_v13, 5  ;;  %v5821_v62 = vcombine.low %v5756_v19, %v5760_v24  ;;  %v5846_v21 = vld [vmem:[%s5798_s16 + $0x14] sm:$0xf]  ;;  %v5440_v36 = vld [vmem:[%s6937_s2 + $0xa8] sm:$0xff]  }
  0x1f   : > { %v629_v47 = vrot.slane %v628_v39, 4  ;;  %v643_v54 = vrot.slane %v642_v48, 4  ;;  %v657_v56 = vrot.slane %v655_v45, 5  ;;  %v660_v1 = vshrl.u32 %v5811_v59, 16  ;;  %v5439_v22 = vld [vmem:[%s6937_s2 + $0xf0] sm:$0xff]   ;;  %v5442_v41 = vld [vmem:[%s6937_s2 + $0xe8] sm:$0xff]  }
  0x20   : > { %4916 = vmatpush3.bf16.msra.mxu0 %v5426_v8  ;;  %v624_v46 = vsel %vm5779_vm2, %v619_v38, %v623_v31  ;;  %v652_v55 = vor.u32 %v651_v44, %v647_v49  ;;  %v663_v2 = vshll.u32 %v5811_v59, 16  ;;  %v673_v3 = vshrl.u32 %v5814_v60, 16  ;;  %v5872_v45 = vld [vmem:[%s5798_s16 + $0x18] sm:$0xf]  ;;  %s6463_s22 = scalar_select %p2468_p9, 1, 0 }
  0x21   : > { %4944 = vmatpush3.bf16.msra.mxu1 %v5427_v9  ;;  %4917 = vmatprep.subr.bf16.mxu0 %v5428_v10  ;;  %v634_v53 = vsel %vm5779_vm2, %v629_v47, %v633_v35  ;;  %v648_v63 = vsel %vm5779_vm2, %v643_v54, %v647_v49  ;;  %v669_v4 = vshll.u32 %v5814_v60, 16  ;;  %v679_v5 = vshll.u32 %v5817_v61, 16  ;;  %v5836_v9 = vld [vmem:[%s5798_s16 + $0x10] sm:$0xf]  ;;  %v5500_v54 = vld [vmem:[%s6940_s5 + $0x78] sm:$0xff]   ;;  %s4227_s26 = sshll.u32 %s6991_s28, 5 }
  0x22   : > { %4945 = vmatprep.subr.bf16.mxu1 %v5429_v14  ;;  %v4265_v58 = vcombine.low %v624_v46, %v634_v53  ;;  %v653_v0 = vrot.slane %v652_v55, 4  ;;  %v662_v8 = vrot.slane %v660_v1, 4  ;;  %v665_v17 = vrot.slane %v663_v2, 5  ;;  %v5875_v46 = vld [vmem:[%s5798_s16 + $0x1c] sm:$0xf]  ;;  %v5444_v2 = vld [vmem:[%s6937_s2 + $0xa0] sm:$0xff]   ;;  %s6865_s25 = sadd.s32 %s4227_s26, %s4226_s20 }
  0x23   : > { %v671_v18 = vrot.slane %v669_v4, 5  ;;  %v675_v20 = vrot.slane %v673_v3, 4  ;;  %v5853_v23 = vcombine.low %v5811_v59, %v5814_v60  ;;  %v697_v26 = vshrl.u32 %v5836_v9, 16  ;;  %v5882_v53 = vld [vmem:[%s5798_s16 + $0x20] sm:$0xf]  ;;  %s4228_s15 = sshll.u32 %s6865_s25, 3 }
  0x24   : > { %4918 = vmatpush3.bf16.msra.mxu0 %v5428_v10  ;;  %4951 = vmatprep.mubr.bf16.mxu1 %v4265_v58  ;;  %v658_v7 = vsel %vm5779_vm2, %v653_v0, %v657_v56  ;;  %v684_v10 = vshrl.u32 %v5831_v6, 16  ;;  %v693_v32 = vshll.u32 %v5836_v9, 16  ;;  %v703_v35 = vshll.u32 %v5846_v21, 16 }
  0x25   : > { %4946 = vmatpush3.bf16.msra.mxu1 %v5429_v14  ;;  %4919 = vmatprep.subr.bf16.mxu0 %v5430_v25  ;;  %v687_v14 = vshll.u32 %v5831_v6, 16  ;;  %v5840_v15 = vcombine.low %v648_v63, %v658_v7  ;;  %v676_v30 = vor.u32 %v675_v20, %v671_v18  ;;  %v699_v33 = vrot.slane %v697_v26, 4  ;;  %v5899_v63 = vld [vmem:[%s5798_s16 + $0x24] sm:$0xf]  ;;  %v5446_v20 = vld [vmem:[%s6937_s2 + $0x98] sm:$0xff]  }
  0x26   : > { %4947 = vmatprep.subr.bf16.mxu1 %v5431_v29  ;;  %v686_v27 = vrot.slane %v684_v10, 4  ;;  %v695_v40 = vrot.slane %v693_v32, 5  ;;  %v705_v44 = vrot.slane %v703_v35, 5  ;;  %v5894_v56 = vcombine.low %v5872_v45, %v5875_v46  ;;  %v5445_v7 = vld [vmem:[%s6937_s2 + $0xe0] sm:$0xff]  }
  0x27   : > { %v689_v31 = vrot.slane %v687_v14, 5  ;;  %v677_v38 = vrot.slane %v676_v30, 4  ;;  %v711_v58 = vshll.u32 %v5872_v45, 16  ;;  %v721_v3 = vshrl.u32 %v5875_v46, 16 }
  0x28   : > { %4920 = vmatpush3.bf16.msra.mxu0 %v5430_v25  ;;  %v681_v25 = vrot.slane %v679_v5, 5  ;;  %v717_v4 = vshll.u32 %v5875_v46, 16  ;;  %v5909_v5 = vld [vmem:[%s5798_s16 + $0x28] sm:$0xf]  ;;  %v727_v14 = vshll.u32 %v5882_v53, 16  ;;  %v732_v26 = vshrl.u32 %v5899_v63, 16 }
  0x29   : > { %4948 = vmatpush3.bf16.msra.mxu1 %v5431_v29  ;;  %4921 = vmatprep.subr.bf16.mxu0 %v5432_v37  ;;  %v666_v29 = vor.u32 %v665_v17, %v662_v8  ;;  %v690_v39 = vor.u32 %v689_v31, %v686_v27  ;;  %v713_v10 = vrot.slane %v711_v58, 5  ;;  %v973_v17 = vsel %vm5886_vm5, %v4279_v43, %v972_v50  ;;  %v5448_v31 = vld [vmem:[%s6937_s2 + $0xd8] sm:$0xff]  }
  0x2a   : > { %4949 = vmatprep.subr.bf16.mxu1 %v5433_v42  ;;  %v682_v48 = vsel %vm5779_vm2, %v677_v38, %v681_v25  ;;  %v723_v25 = vrot.slane %v721_v3, 4  ;;  %v729_v43 = vrot.slane %v727_v14, 5  ;;  %v745_v32 = vshrl.u32 %v5909_v5, 16 }
  0x2b   : > { %v691_v49 = vrot.slane %v690_v39, 4  ;;  %v741_v35 = vshll.u32 %v5909_v5, 16  ;;  %v974_v39 = vrot.slane %v972_v50, 4  ;;  %v979_v13 = vrot.slane %v5760_v24, 5  ;;  %v5453_v24 = vld [vmem:[%s6937_s2 + $0xc8] sm:$0xff]  }
  0x2c   : > { %4922 = vmatpush3.bf16.msra.mxu0 %v5432_v37  ;;  %v667_v37 = vrot.slane %v666_v29, 4  ;;  %v735_v29 = vshll.u32 %v5899_v63, 16  ;;  %v4280_v14 = vrot.slane %v5756_v19, 9  ;;  %v993_v19 = vrot.slane %v5836_v9, 5 }
  0x2d   : > { %4950 = vmatpush3.bf16.msra.mxu1 %v5433_v42  ;;  %4963 = vmatprep.subr.bf16.mxu0 %v5436_v52  ;;  %v5869_v42 = vcombine.low %v5831_v6, %v5836_v9  ;;  %v696_v0 = vsel %vm5779_vm2, %v691_v49, %v695_v40  ;;  %v976_v12 = vsel %vm5886_vm5, %v974_v39, %v975_v51  ;;  %v4282_v9 = vrot.slane %v5831_v6, 9  ;;  %v5458_v6 = vld [vmem:[%s6937_s2 + $0x130] sm:$0xff]  }
  0x2e   : > { %4991 = vmatprep.subr.bf16.mxu1 %v5437_v57  ;;  %v672_v47 = vsel %vm5779_vm2, %v667_v37, %v671_v18  ;;  %v737_v37 = vrot.slane %v735_v29, 5  ;;  %v4301_v3 = vcombine.low %v973_v17, %v976_v12  ;;  %v986_v17 = vrot.slane %v5814_v60, 5  ;;  %v5463_v12 = vld [vmem:[%s6937_s2 + $0x160] sm:$0xff]  }
  0x2f   : > { %4924 = vmatmul.mubr.bf16.vlgmr.msra.gmra.mxu0 %v5821_v62  ;;  %v5890_v55 = vcombine.low %v672_v47, %v682_v48  ;;  %v747_v47 = vrot.slane %v745_v32, 4  ;;  %v995_v29 = vrot.slane %v993_v19, 4 }
  0x30   : > { %4952 = vmatmul.mubr.bf16.vlgmr.msra.gmra.mxu1 %v5840_v15  ;;  %4964 = vmatpush3.bf16.msra.mxu0 %v5436_v52  ;;  %v700_v52 = vor.u32 %v699_v33, %v695_v40  ;;  %v734_v33 = vrot.slane %v732_v26, 4  ;;  %v988_v60 = vrot.slane %v986_v17, 4  ;;  %v989_v26 = vrot.slane %v5817_v61, 5 }
  0x31   : > { %4992 = vmatpush3.bf16.msra.mxu1 %v5437_v57  ;;  %4965 = vmatprep.subr.bf16.mxu0 %v5438_v16  ;;  %v708_v57 = vshrl.u32 %v5872_v45, 16  ;;  %v996_v61 = vrot.slane %v5846_v21, 5  ;;  %v5459_v21 = vld [vmem:[%s6937_s2 + $0x170] sm:$0xff]  }
  0x32   : > { %4993 = vmatprep.subr.bf16.mxu1 %v5439_v22  ;;  %4927 = vmatprep.mubr.bf16.mxu0 %v5853_v23  ;;  %v701_v1 = vrot.slane %v700_v52, 4  ;;  %v738_v49 = vor.u32 %v737_v37, %v734_v33  ;;  %v990_v33 = vsel %vm5886_vm5, %v988_v60, %v989_v26  ;;  %v1003_v37 = vrot.slane %v5882_v53, 5  ;;  %v5461_v53 = vld [vmem:[%s6937_s2 + $0x168] sm:$0xff]   ;;  %v5471_v60 = vld [vmem:[%s6937_s2 + $0x100] sm:$0xff]  }
  0x33   : > { %4955 = vmatprep.mubr.bf16.mxu1 %v5890_v55  ;;  %v710_v8 = vrot.slane %v708_v57, 4  ;;  %v5450_v57 = vld [vmem:[%s6937_s2 + $0x90] sm:$0xff]   ;;  %v997_v39 = vsel %vm5886_vm5, %v995_v29, %v996_v61  ;;  %v6106_v26 = vld [vmem:[%s5731_s24 + $0x20] sm:$0xf] }
  0x34   : > { %4966 = vmatpush3.bf16.msra.mxu0 %v5438_v16  ;;  %v5917_v16 = vld [vmem:[%s5798_s16 + $0x2c] sm:$0xf]  ;;  %v706_v18 = vsel %vm5779_vm2, %v701_v1, %v705_v44  ;;  %v743_v44 = vrot.slane %v741_v35, 5  ;;  %v739_v1 = vrot.slane %v738_v49, 4  ;;  %v4283_v35 = vrot.slane %v5872_v45, 9 }
  0x35   : > { %4994 = vmatpush3.bf16.msra.mxu1 %v5439_v22  ;;  %4967 = vmatprep.subr.bf16.mxu0 %v5440_v36  ;;  %v719_v22 = vrot.slane %v717_v4, 5  ;;  %v5932_v27 = vcombine.low %v696_v0, %v706_v18  ;;  %v714_v11 = vor.u32 %v713_v10, %v710_v8  ;;  %v751_v38 = vshll.u32 %v5917_v16, 16  ;;  %v5452_v8 = vld [vmem:[%s6937_s2 + $0x88] sm:$0xff]  }
  0x36   : > { %4995 = vmatprep.subr.bf16.mxu1 %v5442_v41  ;;  %v748_v58 = vor.u32 %v747_v47, %v743_v44  ;;  %v744_v4 = vsel %vm5779_vm2, %v739_v1, %v743_v44  ;;  %v981_v18 = vrot.slane %v979_v13, 4  ;;  %v5460_v45 = vld [vmem:[%s6937_s2 + $0x128] sm:$0xff]   ;;  %v5466_v1 = vld [vmem:[%s6937_s2 + $0x158] sm:$0xff]  }
  0x37   : > { %4928 = vmatmul.mubr.bf16.gmra.mxu0 %v5869_v42  ;;  %v724_v30 = vor.u32 %v723_v25, %v719_v22  ;;  %v753_v52 = vrot.slane %v751_v38, 5  ;;  %v5455_v25 = vld [vmem:[%s6937_s2 + $0xc0] sm:$0xff]   ;;  %v994_v38 = vsel %vm5886_vm5, %v4282_v9, %v993_v19 }
  0x38   : > { %4968 = vmatpush3.bf16.msra.mxu0 %v5440_v36  ;;  %4931 = vmatprep.mubr.bf16.mxu0 %v5894_v56  ;;  %v715_v36 = vrot.slane %v714_v11, 4  ;;  %v749_v51 = vrot.slane %v748_v58, 4  ;;  %v980_v11 = vsel %vm5886_vm5, %v4280_v14, %v979_v13  ;;  %v6037_v44 = vcombine.low %v994_v38, %v997_v39 }
  0x39   : > { %4996 = vmatpush3.bf16.msra.mxu1 %v5442_v41  ;;  %4969 = vmatprep.subr.bf16.mxu0 %v5444_v2  ;;  %v725_v40 = vrot.slane %v724_v30, 4  ;;  %v5947_v41 = vcombine.low %v5899_v63, %v5909_v5  ;;  %v1000_v30 = vrot.slane %v5875_v46, 5 }
  0x3a   : > { %4956 = vmatmul.mubr.bf16.gmra.mxu1 %v5932_v27  ;;  %4997 = vmatprep.subr.bf16.mxu1 %v5445_v7  ;;  %v720_v48 = vsel %vm5779_vm2, %v715_v36, %v719_v22  ;;  %v5454_v22 = vld [vmem:[%s6937_s2 + $0x80] sm:$0xff]  }
  0x3b   : > { %v730_v50 = vsel %vm5779_vm2, %v725_v40, %v729_v43  ;;  %v1002_v36 = vrot.slane %v1000_v30, 4  ;;  %v1007_v40 = vrot.slane %v5909_v5, 5  ;;  %v1001_v5 = vsel %vm5886_vm5, %v4283_v35, %v1000_v30 }
  0x3c   : > { %4970 = vmatpush3.bf16.msra.mxu0 %v5444_v2  ;;  %v5960_v0 = vcombine.low %v720_v48, %v730_v50  ;;  %v5451_v2 = vld [vmem:[%s6937_s2 + $0xd0] sm:$0xff]   ;;  %v4284_v48 = vrot.slane %v5899_v63, 9  ;;  %v5464_v63 = vld [vmem:[%s6937_s2 + $0x118] sm:$0xff]  }
  0x3d   : > { %4998 = vmatpush3.bf16.msra.mxu1 %v5445_v7  ;;  %4971 = vmatprep.subr.bf16.mxu0 %v5446_v20  ;;  %v754_v7 = vsel %vm5779_vm2, %v749_v51, %v753_v52  ;;  %v1004_v47 = vsel %vm5886_vm5, %v1002_v36, %v1003_v37  ;;  %v1009_v49 = vrot.slane %v1007_v40, 4  ;;  %v1010_v52 = vrot.slane %v5917_v16, 5  ;;  %v5467_v51 = vld [vmem:[%s6937_s2 + $0x110] sm:$0xff]   ;;  %v5473_v37 = vld [vmem:[%s6937_s2 + $0x1b8] sm:$0xff]  }
  0x3e   : > { %4999 = vmatprep.subr.bf16.mxu1 %v5448_v31  ;;  %4959 = vmatprep.mubr.bf16.mxu1 %v5960_v0  ;;  %v5975_v10 = vcombine.low %v744_v4, %v754_v7  ;;  %v6052_v50 = vcombine.low %v1001_v5, %v1004_v47  ;;  %v1008_v16 = vsel %vm5886_vm5, %v4284_v48, %v1007_v40  ;;  %v1622_v48 = vrot.slane %v6106_v26, 5 }
  0x3f   : > { %4932 = vmatmul.mubr.bf16.gmra.mxu0 %v5947_v41  ;;  %v1011_v58 = vsel %vm5886_vm5, %v1009_v49, %v1010_v52  ;;  %v5475_v52 = vld [vmem:[%s6937_s2 + $0x1b0] sm:$0xff]  }
  0x40   : > { %4972 = vmatpush3.bf16.msra.mxu0 %v5446_v20  ;;  %4979 = vmatprep.mubr.bf16.mxu0 %v4301_v3  ;;  %v982_v20 = vrot.slane %v5770_v28, 5  ;;  %v4281_v28 = vrot.slane %v5811_v59, 9  ;;  %v5457_v59 = vld [vmem:[%s6937_s2 + $0x178] sm:$0xff]   ;;  %v6073_v13 = vcombine.low %v1008_v16, %v1011_v58 }
  0x41   : > { %5000 = vmatpush3.bf16.msra.mxu1 %v5448_v31  ;;  %4973 = vmatprep.subr.bf16.mxu0 %v5450_v57  ;;  %v6070_v3 = vld [vmem:[%s5731_s24 + $0x1c] sm:$0xf] }
  0x42   : > { %5001 = vmatprep.subr.bf16.mxu1 %v5451_v2  ;;  %4960 = vmatmul.mubr.bf16.gmra.mxu1 %v5975_v10  ;;  %v983_v43 = vsel %vm5886_vm5, %v981_v18, %v982_v20  ;;  %v987_v32 = vsel %vm5886_vm5, %v4281_v28, %v986_v17  ;;  %v1420_v14 = vshrl.u32 %v6070_v3, 16  ;;  %v1416_v17 = vshll.u32 %v6070_v3, 16  ;;  %v5469_v18 = vld [vmem:[%s6937_s2 + $0x108] sm:$0xff]  }
  0x43   : > { %5007 = vmatprep.mubr.bf16.mxu1 %v5821_v62  ;;  %v5456_v62 = vld [vmem:[%s6937_s2 + $0x138] sm:$0xff]   ;;  %v6007_v31 = vcombine.low %v980_v11, %v983_v43  ;;  %v6019_v46 = vcombine.low %v987_v32, %v990_v33  ;;  %v5472_v11 = vld [vmem:[%s6937_s2 + $0x140] sm:$0xff]   ;;  %v6124_v32 = vld [vmem:[%s5731_s24 + $0x2c] sm:$0xf] }
  0x44   : > { %4974 = vmatpush3.bf16.msra.mxu0 %v5450_v57  ;;  %v5462_v57 = vld [vmem:[%s6937_s2 + $0x120] sm:$0xff]   ;;  %v6099_v19 = vrot.slane %v1416_v17, 5  ;;  %v1422_v28 = vrot.slane %v1420_v14, 4  ;;  %v2018_v36 = vshll.u32 %v6124_v32, 16  ;;  %v5482_v17 = vld [vmem:[%s6937_s2 + $0x1d8] sm:$0xff]  }
  0x45   : > { %5002 = vmatpush3.bf16.msra.mxu1 %v5451_v2  ;;  %4975 = vmatprep.subr.bf16.mxu0 %v5452_v8  ;;  %v6067_v2 = vld [vmem:[%s5731_s24 + $0x18] sm:$0xf] }
  0x46   : > { %5003 = vmatprep.subr.bf16.mxu1 %v5453_v24  ;;  %v6081_v4 = vcombine.low %v6067_v2, %v6070_v3  ;;  %v1407_v7 = vshrl.u32 %v6067_v2, 16  ;;  %v1423_v30 = vor.u32 %v1422_v28, %v6099_v19  ;;  %v4365_v40 = vrot.slane %v6067_v2, 9  ;;  %v5485_v28 = vld [vmem:[%s6937_s2 + $0x188] sm:$0xff]  }
  0x48   : > { %4976 = vmatpush3.bf16.msra.mxu0 %v5452_v8  ;;  %v1410_v8 = vshll.u32 %v6067_v2, 16  ;;  %v1409_v20 = vrot.slane %v1407_v7, 4  ;;  %v1424_v5 = vrot.slane %v1423_v30, 4  ;;  %v5478_v2 = vld [vmem:[%s6937_s2 + $0x1e8] sm:$0xff]   ;;  %v5480_v7 = vld [vmem:[%s6937_s2 + $0x1e0] sm:$0xff]  }
  0x49   : > { %5004 = vmatpush3.bf16.msra.mxu1 %v5453_v24  ;;  %4977 = vmatprep.subr.bf16.mxu0 %v5454_v22  ;;  %v5468_v24 = vld [vmem:[%s6937_s2 + $0x150] sm:$0xff]  }
  0x4a   : > { %5005 = vmatprep.subr.bf16.mxu1 %v5455_v25 }
  0x4c   : > { %4978 = vmatpush3.bf16.msra.mxu0 %v5454_v22  ;;  %v1412_v22 = vrot.slane %v1410_v8, 5  ;;  %v5481_v8 = vld [vmem:[%s6937_s2 + $0x198] sm:$0xff]  }
  0x4d   : > { %5006 = vmatpush3.bf16.msra.mxu1 %v5455_v25  ;;  %5019 = vmatprep.subr.bf16.mxu0 %v5456_v62  ;;  %v5470_v25 = vld [vmem:[%s6937_s2 + $0x148] sm:$0xff]  }
  0x4e   : > { %5047 = vmatprep.subr.bf16.mxu1 %v5457_v59  ;;  %v1413_v43 = vor.u32 %v1412_v22, %v1409_v20 }
  0x4f   : > { %4980 = vmatmul.mubr.bf16.vlgmr.msra.gmra.mxu0 %v6007_v31 }
  0x50   : > { %5020 = vmatpush3.bf16.msra.mxu0 %v5456_v62  ;;  %5008 = vmatmul.mubr.bf16.vlgmr.msra.gmra.mxu1 %v5853_v23  ;;  %v6112_v62 = vld [vmem:[%s5731_s24 + $0x24] sm:$0xf]  ;;  %v1414_v39 = vrot.slane %v1413_v43, 4  ;;  %v5489_v43 = vld [vmem:[%s6937_s2 + $0x238] sm:$0xff]  }
  0x51   : > { %5048 = vmatpush3.bf16.msra.mxu1 %v5457_v59  ;;  %5021 = vmatprep.subr.bf16.mxu0 %v5458_v6  ;;  %v1619_v59 = vrot.slane %v6070_v3, 5  ;;  %v1999_v9 = vshrl.u32 %v6112_v62, 16  ;;  %v2002_v61 = vshll.u32 %v6112_v62, 16  ;;  %v5484_v3 = vld [vmem:[%s6937_s2 + $0x1d0] sm:$0xff]  }
  0x52   : > { %5049 = vmatprep.subr.bf16.mxu1 %v5459_v21  ;;  %4983 = vmatprep.mubr.bf16.mxu0 %v6019_v46 }
  0x53   : > { %5011 = vmatprep.mubr.bf16.mxu1 %v5869_v42  ;;  %v1621_v47 = vrot.slane %v1619_v59, 4 }
  0x54   : > { %5022 = vmatpush3.bf16.msra.mxu0 %v5458_v6  ;;  %v2001_v6 = vrot.slane %v1999_v9, 4 }
  0x55   : > { %5050 = vmatpush3.bf16.msra.mxu1 %v5459_v21  ;;  %5023 = vmatprep.subr.bf16.mxu0 %v5460_v45  ;;  %v2004_v21 = vrot.slane %v2002_v61, 5  ;;  %v1623_v20 = vsel %vm5886_vm5, %v1621_v47, %v1622_v48  ;;  %v4441_v61 = vrot.slane %v6112_v62, 9  ;;  %v5505_v48 = vld [vmem:[%s6940_s5 + $0x18] sm:$0xff]  }
  0x56   : > { %5051 = vmatprep.subr.bf16.mxu1 %v5461_v53 }
  0x57   : > { %4984 = vmatmul.mubr.bf16.gmra.mxu0 %v6037_v44 }
  0x58   : > { %5024 = vmatpush3.bf16.msra.mxu0 %v5460_v45  ;;  %5012 = vmatmul.mubr.bf16.gmra.mxu1 %v5894_v56  ;;  %v2005_v45 = vor.u32 %v2004_v21, %v2001_v6 }
  0x59   : > { %5052 = vmatpush3.bf16.msra.mxu1 %v5461_v53  ;;  %5025 = vmatprep.subr.bf16.mxu0 %v5462_v57  ;;  %v5474_v53 = vld [vmem:[%s6937_s2 + $0x1f8] sm:$0xff]  }
  0x5a   : > { %5053 = vmatprep.subr.bf16.mxu1 %v5463_v12  ;;  %4987 = vmatprep.mubr.bf16.mxu0 %v6052_v50  ;;  %v6149_v16 = vrot.slane %v2005_v45, 4 }
  0x5b   : > { %5015 = vmatprep.mubr.bf16.mxu1 %v5947_v41 }
  0x5c   : > { %5026 = vmatpush3.bf16.msra.mxu0 %v5462_v57 }
  0x5d   : > { %5054 = vmatpush3.bf16.msra.mxu1 %v5463_v12  ;;  %5027 = vmatprep.subr.bf16.mxu0 %v5464_v63  ;;  %v6144_v12 = vrot.slane %v2018_v36, 5 }
  0x5e   : > { %5055 = vmatprep.subr.bf16.mxu1 %v5466_v1 }
  0x5f   : > { %4988 = vmatmul.mubr.bf16.gmra.mxu0 %v6073_v13 }
  0x60   : > { %5028 = vmatpush3.bf16.msra.mxu0 %v5464_v63  ;;  %5016 = vmatmul.mubr.bf16.gmra.mxu1 %v6081_v4  ;;  %v5476_v63 = vld [vmem:[%s6937_s2 + $0x1f0] sm:$0xff]  }
  0x61   : > { %5056 = vmatpush3.bf16.msra.mxu1 %v5466_v1  ;;  %5029 = vmatprep.subr.bf16.mxu0 %v5467_v51  ;;  %v5477_v1 = vld [vmem:[%s6937_s2 + $0x1a8] sm:$0xff]  }
  0x62   : > { %5057 = vmatprep.subr.bf16.mxu1 %v5468_v24  ;;  %5035 = vmatprep.mubr.bf16.mxu0 %v5840_v15  ;;  %v6115_v15 = vld [vmem:[%s5731_s24 + $0x28] sm:$0xf]  ;;  %s2465_s24 = scalar_select %p2464_p8, 1, 0 }
  0x63   : > { %5063 = vmatprep.mubr.bf16.mxu1 %v6007_v31  ;;  %v2012_v29 = vshrl.u32 %v6115_v15, 16  ;;  %v1426_v31 = vshll.u32 %v6106_v26, 16  ;;  %v2008_v33 = vshll.u32 %v6115_v15, 16  ;;  %v5487_v26 = vld [vmem:[%s6937_s2 + $0x180] sm:$0xff]   ;;  %v2211_v9 = vrot.slane %v6115_v15, 5 }
  0x64   : > { %5030 = vmatpush3.bf16.msra.mxu0 %v5467_v51  ;;  %v5479_v51 = vld [vmem:[%s6937_s2 + $0x1a0] sm:$0xff]  }
  0x65   : > { %5058 = vmatpush3.bf16.msra.mxu1 %v5468_v24  ;;  %5031 = vmatprep.subr.bf16.mxu0 %v5469_v18  ;;  %v2014_v35 = vrot.slane %v2012_v29, 4  ;;  %v6131_v38 = vrot.slane %v2008_v33, 5  ;;  %v1428_v57 = vrot.slane %v1426_v31, 5  ;;  %v1419_v24 = vsel %vm5779_vm2, %v1414_v39, %v6099_v19  ;;  %v5503_v39 = vld [vmem:[%s6940_s5 + $0x20] sm:$0xff]  }
  0x66   : > { %5059 = vmatprep.subr.bf16.mxu1 %v5470_v25  ;;  %v2213_v29 = vrot.slane %v2211_v9, 4  ;;  %v2212_v30 = vsel %vm5886_vm5, %v4441_v61, %v2211_v9  ;;  %v6347_v9 = vld [vmem:[%s6940_s5 + $0xf8] sm:$0xff]  }
  0x67   : > { %v2015_v49 = vor.u32 %v2014_v35, %v6131_v38  ;;  %v1429_v14 = vsel %vm5779_vm2, %v1424_v5, %v1428_v57  ;;  %v5504_v5 = vld [vmem:[%s6940_s5 + $0x68] sm:$0xff]   ;;  %6951 = vst [vmem:[#allocation5_spill] sm:$0xff] %v6347_v9 }
  0x68   : > { %5032 = vmatpush3.bf16.msra.mxu0 %v5469_v18  ;;  %v1620_v18 = vsel %vm5886_vm5, %v4365_v40, %v1619_v59  ;;  %v4356_v22 = vcombine.low %v1419_v24, %v1429_v14  ;;  %v5492_v59 = vld [vmem:[%s6937_s2 + $0x220] sm:$0xff]   ;;  %v5508_v24 = vld [vmem:[%s6940_s5 + $0x58] sm:$0xff]  }
  0x69   : > { %5060 = vmatpush3.bf16.msra.mxu1 %v5470_v25  ;;  %5033 = vmatprep.subr.bf16.mxu0 %v5471_v60  ;;  %v6151_v58 = vrot.slane %v2015_v49, 4  ;;  %v5483_v25 = vld [vmem:[%s6937_s2 + $0x190] sm:$0xff]   ;;  %v6193_v19 = vcombine.low %v1620_v18, %v1623_v20 }
  0x6a   : > { %5061 = vmatprep.subr.bf16.mxu1 %v5472_v11  ;;  %v5510_v20 = vld [vmem:[%s6940_s5 + $0x50] sm:$0xff]  }
  0x6c   : > { %5034 = vmatpush3.bf16.msra.mxu0 %v5471_v60  ;;  %v5486_v60 = vld [vmem:[%s6937_s2 + $0x1c8] sm:$0xff]  }
  0x6d   : > { %5062 = vmatpush3.bf16.msra.mxu1 %v5472_v11  ;;  %5075 = vmatprep.subr.bf16.mxu0 %v5473_v37  ;;  %v5488_v11 = vld [vmem:[%s6937_s2 + $0x1c0] sm:$0xff]  }
  0x6e   : > { %5103 = vmatprep.subr.bf16.mxu1 %v5474_v53 }
  0x6f   : > { %5036 = vmatmul.mubr.bf16.vlgmr.msra.gmra.mxu0 %v5890_v55 }
  0x70   : > { %5076 = vmatpush3.bf16.msra.mxu0 %v5473_v37  ;;  %5064 = vmatmul.mubr.bf16.vlgmr.msra.gmra.mxu1 %v6019_v46  ;;  %v5502_v37 = vld [vmem:[%s6940_s5 + $0x70] sm:$0xff]  }
  0x71   : > { %5104 = vmatpush3.bf16.msra.mxu1 %v5474_v53  ;;  %5077 = vmatprep.subr.bf16.mxu0 %v5475_v52 }
  0x72   : > { %5105 = vmatprep.subr.bf16.mxu1 %v5476_v63  ;;  %5039 = vmatprep.mubr.bf16.mxu0 %v5932_v27 }
  0x73   : > { %5067 = vmatprep.mubr.bf16.mxu1 %v6037_v44 }
  0x74   : > { %5078 = vmatpush3.bf16.msra.mxu0 %v5475_v52 }
  0x75   : > { %5106 = vmatpush3.bf16.msra.mxu1 %v5476_v63  ;;  %5079 = vmatprep.subr.bf16.mxu0 %v5477_v1  ;;  %v5506_v63 = vld [vmem:[%s6940_s5 + $0x60] sm:$0xff]  }
  0x76   : > { %5107 = vmatprep.subr.bf16.mxu1 %v5478_v2 }
  0x77   : > { %5040 = vmatmul.mubr.bf16.gmra.mxu0 %v5960_v0 }
  0x78   : > { %5080 = vmatpush3.bf16.msra.mxu0 %v5477_v1  ;;  %5068 = vmatmul.mubr.bf16.gmra.mxu1 %v6052_v50 }
  0x79   : > { %5108 = vmatpush3.bf16.msra.mxu1 %v5478_v2  ;;  %5081 = vmatprep.subr.bf16.mxu0 %v5479_v51 }
  0x7a   : > { %5109 = vmatprep.subr.bf16.mxu1 %v5480_v7  ;;  %5043 = vmatprep.mubr.bf16.mxu0 %v5975_v10 }
  0x7b   : > { %5071 = vmatprep.mubr.bf16.mxu1 %v6073_v13 }
  0x7c   : > { %5082 = vmatpush3.bf16.msra.mxu0 %v5479_v51 }
  0x7d   : > { %5110 = vmatpush3.bf16.msra.mxu1 %v5480_v7  ;;  %5083 = vmatprep.subr.bf16.mxu0 %v5481_v8 }
  0x7e   : > { %5111 = vmatprep.subr.bf16.mxu1 %v5482_v17 }
  0x7f   : > { %5044 = vmatmul.mubr.bf16.gmra.mxu0 %v4356_v22 }
  0x80   : > { %5084 = vmatpush3.bf16.msra.mxu0 %v5481_v8  ;;  %5072 = vmatmul.mubr.bf16.gmra.mxu1 %v6193_v19 }
  0x81   : > { %5112 = vmatpush3.bf16.msra.mxu1 %v5482_v17  ;;  %5085 = vmatprep.subr.bf16.mxu0 %v5483_v25  ;;  %v5509_v17 = vld [vmem:[%s6940_s5 + $0x8] sm:$0xff]  }
  0x82   : > { %5113 = vmatprep.subr.bf16.mxu1 %v5484_v3  ;;  %5091 = vmatprep.mubr.bf16.mxu0 %v5853_v23  ;;  %v5490_v23 = vld [vmem:[%s6937_s2 + $0x230] sm:$0xff]  }
  0x83   : > { %5119 = vmatprep.mubr.bf16.mxu1 %v5890_v55  ;;  %v5491_v55 = vld [vmem:[%s6937_s2 + $0x228] sm:$0xff]  }
  0x84   : > { %5086 = vmatpush3.bf16.msra.mxu0 %v5483_v25 }
  0x85   : > { %5114 = vmatpush3.bf16.msra.mxu1 %v5484_v3  ;;  %5087 = vmatprep.subr.bf16.mxu0 %v5485_v28 }
  0x86   : > { %5115 = vmatprep.subr.bf16.mxu1 %v5486_v60 }
  0x88   : > { %5088 = vmatpush3.bf16.msra.mxu0 %v5485_v28 }
  0x89   : > { %5116 = vmatpush3.bf16.msra.mxu1 %v5486_v60  ;;  %5089 = vmatprep.subr.bf16.mxu0 %v5487_v26 }
  0x8a   : > { %5117 = vmatprep.subr.bf16.mxu1 %v5488_v11 }
  0x8c   : > { %5090 = vmatpush3.bf16.msra.mxu0 %v5487_v26  ;;  %v5512_v26 = vld [vmem:[%s6940_s5 + $0x48] sm:$0xff]  }
  0x8d   : > { %5118 = vmatpush3.bf16.msra.mxu1 %v5488_v11  ;;  %5131 = vmatprep.subr.bf16.mxu0 %v5489_v43 }
  0x8f   : > { %5092 = vmatmul.mubr.bf16.vlgmr.msra.gmra.mxu0 %v5869_v42  ;;  %v5494_v42 = vld [vmem:[%s6937_s2 + $0x218] sm:$0xff]  }
  0x90   : > { %5132 = vmatpush3.bf16.msra.mxu0 %v5489_v43  ;;  %5120 = vmatmul.mubr.bf16.vlgmr.msra.gmra.mxu1 %v5932_v27  ;;  %v2021_v27 = vsel %vm5779_vm2, %v6151_v58, %v6144_v12  ;;  %v5507_v58 = vld [vmem:[%s6940_s5 + $0x10] sm:$0xff]  }
  0x91   : > { %5133 = vmatprep.subr.bf16.mxu0 %v5490_v23  ;;  %5095 = vmatprep.mubr.bf16.mxu0 %v5894_v56  ;;  %v2011_v56 = vsel %vm5779_vm2, %v6149_v16, %v6131_v38 }
  0x92   : > { %5123 = vmatprep.mubr.bf16.mxu1 %v5960_v0  ;;  %v4432_v0 = vcombine.low %v2011_v56, %v2021_v27  ;;  %v5514_v27 = vld [vmem:[%s6940_s5 + $0x40] sm:$0xff]  }
  0x94   : > { %5134 = vmatpush3.bf16.msra.mxu0 %v5490_v23  ;;  %v6328_v23 = vld [vmem:[%s6940_s5 + $0xb8] sm:$0xff]  }
  0x95   : > { %5135 = vmatprep.subr.bf16.mxu0 %v5491_v55  ;;  %6950 = vst [vmem:[#allocation4_spill] sm:$0xff] %v6328_v23 }
  0x97   : > { %5096 = vmatmul.mubr.bf16.gmra.mxu0 %v5947_v41  ;;  %v4407_v41 = vcombine.low %v6112_v62, %v6115_v15  ;;  %v5499_v62 = vld [vmem:[%s6940_s5 + $0x30] sm:$0xff]  }
  0x98   : > { %5136 = vmatpush3.bf16.msra.mxu0 %v5491_v55  ;;  %5124 = vmatmul.mubr.bf16.gmra.mxu1 %v5975_v10  ;;  %v5495_v10 = vld [vmem:[%s6937_s2 + $0x210] sm:$0xff]  }
  0x99   : > { %5137 = vmatprep.subr.bf16.mxu0 %v5492_v59  ;;  %5099 = vmatprep.mubr.bf16.mxu0 %v6081_v4  ;;  %v5497_v4 = vld [vmem:[%s6937_s2 + $0x200] sm:$0xff]  }
  0x9a   : > { %5127 = vmatprep.mubr.bf16.mxu1 %v4356_v22 }
  0x9c   : > { %5138 = vmatpush3.bf16.msra.mxu0 %v5492_v59 }
  0x9d   : > { %5139 = vmatprep.subr.bf16.mxu0 %v5494_v42 }
  0x9f   : > { %5100 = vmatmul.mubr.bf16.gmra.mxu0 %v4407_v41 }
  0xa0   : > { %5140 = vmatpush3.bf16.msra.mxu0 %v5494_v42  ;;  %5128 = vmatmul.mubr.bf16.gmra.mxu1 %v4432_v0 }
  0xa1   : > { %5141 = vmatprep.subr.bf16.mxu0 %v5495_v10  ;;  %5147 = vmatprep.mubr.bf16.mxu0 %v6019_v46  ;;  %v2214_v46 = vrot.slane %v6124_v32, 5  ;;  %v5501_v32 = vld [vmem:[%s6940_s5 + $0x28] sm:$0xff]  }
  0xa3   : > { %v2215_v31 = vsel %vm5886_vm5, %v2213_v29, %v2214_v46 }
  0xa4   : > { %5142 = vmatpush3.bf16.msra.mxu0 %v5495_v10 }
  0xa5   : > { %5143 = vmatprep.subr.bf16.mxu0 %v5496_v34 }
  0xa8   : > { %5144 = vmatpush3.bf16.msra.mxu0 %v5496_v34 }
  0xa9   : > { %5145 = vmatprep.subr.bf16.mxu0 %v5497_v4 }
  0xac   : > { %5146 = vmatpush3.bf16.msra.mxu0 %v5497_v4 }
  0xad   : > { %5183 = vmatprep.subr.bf16.mxu0 %v5500_v54 }
  0xaf   : > { %5148 = vmatmul.mubr.bf16.vlgmr.msra.gmra.mxu0 %v6037_v44  ;;  %v4458_v44 = vcombine.low %v2212_v30, %v2215_v31 }
  0xb0   : > { %5151 = vmatprep.mubr.bf16.mxu0 %v6052_v50  ;;  %v5498_v50 = vld [vmem:[%s6940_s5 + $0x38] sm:$0xff]   ;;  %5184 = vmatpush3.bf16.msra.mxu0 %v5500_v54 }
  0xb1   : > { %5159 = vmatprep.subr.bf16.mxu1 %v5498_v50  ;;  %5185 = vmatprep.subr.bf16.mxu0 %v5502_v37 }
  0xb2   : > { %5160 = vmatpush3.bf16.msra.mxu1 %v5498_v50 }
  0xb3   : > { %5161 = vmatprep.subr.bf16.mxu1 %v5499_v62 }
  0xb4   : > { %5186 = vmatpush3.bf16.msra.mxu0 %v5502_v37 }
  0xb5   : > { %5187 = vmatprep.subr.bf16.mxu0 %v5504_v5 }
  0xb6   : > { %5162 = vmatpush3.bf16.msra.mxu1 %v5499_v62 }
  0xb7   : > { %5152 = vmatmul.mubr.bf16.gmra.mxu0 %v6073_v13  ;;  %5163 = vmatprep.subr.bf16.mxu1 %v5501_v32 }
  0xb8   : > { %5155 = vmatprep.mubr.bf16.mxu0 %v6193_v19  ;;  %5188 = vmatpush3.bf16.msra.mxu0 %v5504_v5  ;;  %v5511_v19 = vld [vmem:[%s6940_s5] sm:$0xff]  }
  0xb9   : > { %5189 = vmatprep.subr.bf16.mxu0 %v5506_v63 }
  0xba   : > { %5164 = vmatpush3.bf16.msra.mxu1 %v5501_v32 }
  0xbb   : > { %5165 = vmatprep.subr.bf16.mxu1 %v5503_v39 }
  0xbc   : > { %5190 = vmatpush3.bf16.msra.mxu0 %v5506_v63 }
  0xbd   : > { %5191 = vmatprep.subr.bf16.mxu0 %v5508_v24 }
  0xbe   : > { %5166 = vmatpush3.bf16.msra.mxu1 %v5503_v39 }
  0xbf   : > { %5156 = vmatmul.mubr.bf16.gmra.mxu0 %v4458_v44  ;;  %5167 = vmatprep.subr.bf16.mxu1 %v5505_v48 }
  0xc0   : > { %5192 = vmatpush3.bf16.msra.mxu0 %v5508_v24 }
  0xc1   : > { %5193 = vmatprep.subr.bf16.mxu0 %v5510_v20 }
  0xc2   : > { %5168 = vmatpush3.bf16.msra.mxu1 %v5505_v48 }
  0xc3   : > { %5169 = vmatprep.subr.bf16.mxu1 %v5507_v58 }
  0xc4   : > { %5194 = vmatpush3.bf16.msra.mxu0 %v5510_v20 }
  0xc5   : > { %5195 = vmatprep.subr.bf16.mxu0 %v5512_v26 }
  0xc6   : > { %5170 = vmatpush3.bf16.msra.mxu1 %v5507_v58 }
  0xc7   : > { %5171 = vmatprep.subr.bf16.mxu1 %v5509_v17 }
  0xc8   : > { %5196 = vmatpush3.bf16.msra.mxu0 %v5512_v26 }
  0xc9   : > { %5197 = vmatprep.subr.bf16.mxu0 %v5514_v27 }
  0xca   : > { %5172 = vmatpush3.bf16.msra.mxu1 %v5509_v17 }
  0xcb   : > { %5173 = vmatprep.subr.bf16.mxu1 %v5511_v19 }
  0xcc   : > { %5198 = vmatpush3.bf16.msra.mxu0 %v5514_v27 }
  0xcd   : > { %5231 = vmatprep.subr.bf16.mxu0 %v6347_v9 }
  0xce   : > { %5174 = vmatpush3.bf16.msra.mxu1 %v5511_v19 }
  0xcf   : > { %5207 = vmatprep.subr.bf16.mxu1 %v6328_v23 }
  0xef   : > { %v4925_v13 = vpop.f32.mrf.mxu0 }
  0xf0   : > { %v4953_v15 = vpop.f32.mrf.mxu1 }
  0xf1   : > { %v6278_v33 = vadd.f32 %v4953_v15, %v4925_v13  ;;  %v549_v6 = vpop.f32.mrf.mxu0 }
  0xf2   : > { %v878_v21 = vpop.f32.mrf.mxu1 }
  0xf3   : > { %v6280_v35 = vadd.f32 %v878_v21, %v549_v6  ;;  %v4926_v36 = vpop.f32.mrf.mxu0 }
  0xf4   : > { %v4954_v38 = vpop.f32.mrf.mxu1 }
  0xf5   : > { %v6288_v40 = vadd.f32 %v4954_v38, %v4926_v36  ;;  %v6290_v45 = vpop.f32.mrf.mxu0 }
  0xf6   : > { %v6295_v47 = vpop.f32.mrf.mxu1 }
  0xf7   : > { %v4929_v53 = vpop.f32.mrf.mxu0 }
  0xf9   : > { %v565_v49 = vpop.f32.mrf.mxu0 }
  0xfa   : > { %v4957_v52 = vpop.f32.mrf.mxu1 }
  0xfb   : > { %v943_v57 = vadd.f32 %v4957_v52, %v4929_v53  ;;  %v4930_v12 = vpop.f32.mrf.mxu0 }
  0xfc   : > { %v894_v16 = vpop.f32.mrf.mxu1 }
  0xfd   : > { %v941_v1 = vadd.f32 %v894_v16, %v565_v49  ;;  %v6306_v2 = vpop.f32.mrf.mxu0 }
  0xfe   : > { %v4958_v51 = vpop.f32.mrf.mxu1 }
  0xff   : > { %v944_v7 = vadd.f32 %v4958_v51, %v4930_v12  ;;  %v4933_v8 = vpop.f32.mrf.mxu0 }
 0x100   : > { %v6311_v14 = vpop.f32.mrf.mxu1 }
 0x101   : > { %v581_v18 = vpop.f32.mrf.mxu0 }
 0x102   : > { %v4961_v22 = vpop.f32.mrf.mxu1 }
 0x103   : > { %v4934_v25 = vpop.f32.mrf.mxu0  ;;  %v947_v3 = vadd.f32 %v4961_v22, %v4933_v8 }
 0x104   : > { %v910_v28 = vpop.f32.mrf.mxu1 }
 0x105   : > { %v945_v60 = vadd.f32 %v910_v28, %v581_v18  ;;  %v584_v43 = vpop.f32.mrf.mxu0 }
 0x106   : > { %v4962_v11 = vpop.f32.mrf.mxu1 }
 0x107   : > { %v948_v55 = vadd.f32 %v4962_v11, %v4934_v25 }
 0x108   : > { %v913_v59 = vpop.f32.mrf.mxu1 }
 0x109   : > { %v946_v42 = vadd.f32 %v913_v59, %v584_v43 }
 0x10f   : > { %v4981_v56 = vpop.f32.mrf.mxu0 }
 0x110   : > { %v6335_v41 = vadd.f32 %v4981_v56, %v6278_v33  ;;  %v6337_v0 = vpop.f32.mrf.mxu1 }
 0x111   : > { %v1135_v10 = vpop.f32.mrf.mxu0 }
 0x112   : > { %v6340_v34 = vadd.f32 %v1135_v10, %v6280_v35  ;;  %v6342_v4 = vpop.f32.mrf.mxu1 }
 0x113   : > { %v4982_v61 = vpop.f32.mrf.mxu0 }
 0x114   : > { %v6350_v29 = vadd.f32 %v4982_v61, %v6288_v40  ;;  %v6352_v46 = vpop.f32.mrf.mxu1 }
 0x115   : > { %v6355_v30 = vpop.f32.mrf.mxu0 }
 0x116   : > { %v6357_v31 = vpop.f32.mrf.mxu1 }
 0x117   : > { %v4985_v44 = vpop.f32.mrf.mxu0 }
 0x118   : > { %v6359_v50 = vadd.f32 %v4985_v44, %v943_v57  ;;  %v6361_v62 = vpop.f32.mrf.mxu1 }
 0x119   : > { %v1151_v13 = vpop.f32.mrf.mxu0 }
 0x11a   : > { %v6363_v54 = vadd.f32 %v1151_v13, %v941_v1  ;;  %v6365_v15 = vpop.f32.mrf.mxu1 }
 0x11b   : > { %v4986_v32 = vpop.f32.mrf.mxu0 }
 0x11c   : > { %v6367_v33 = vadd.f32 %v4986_v32, %v944_v7  ;;  %v6369_v6 = vpop.f32.mrf.mxu1 }
 0x11d   : > { %v6371_v21 = vpop.f32.mrf.mxu0 }
 0x11e   : > { %v6373_v35 = vpop.f32.mrf.mxu1 }
 0x11f   : > { %v4989_v36 = vpop.f32.mrf.mxu0 }
 0x120   : > { %v1204_v37 = vadd.f32 %v4989_v36, %v947_v3  ;;  %v5017_v38 = vpop.f32.mrf.mxu1 }
 0x121   : > { %v1167_v39 = vpop.f32.mrf.mxu0 }
 0x122   : > { %v1202_v40 = vadd.f32 %v1167_v39, %v945_v60  ;;  %v1392_v53 = vadd.f32 %v5017_v38, %v1204_v37  ;;  %v1355_v5 = vpop.f32.mrf.mxu1 }
 0x123   : > { %v4990_v48 = vpop.f32.mrf.mxu0 }
 0x124   : > { %v1205_v49 = vadd.f32 %v4990_v48, %v948_v55  ;;  %v1390_v52 = vadd.f32 %v1355_v5, %v1202_v40  ;;  %v5018_v57 = vpop.f32.mrf.mxu1 }
 0x125   : > { %v1170_v12 = vpop.f32.mrf.mxu0 }
 0x126   : > { %v1203_v63 = vadd.f32 %v1170_v12, %v946_v42  ;;  %v1393_v16 = vadd.f32 %v5018_v57, %v1205_v49  ;;  %v1358_v58 = vpop.f32.mrf.mxu1 }
 0x128   : > { %v1391_v1 = vadd.f32 %v1358_v58, %v1203_v63 }
 0x12f   : > { %v5037_v51 = vpop.f32.mrf.mxu0 }
 0x130   : > { %v5065_v7 = vpop.f32.mrf.mxu1 }
 0x131   : > { %v1533_v8 = vpop.f32.mrf.mxu0 }
 0x132   : > { %v1727_v24 = vpop.f32.mrf.mxu1 }
 0x133   : > { %v5038_v17 = vpop.f32.mrf.mxu0 }
 0x134   : > { %v5066_v18 = vpop.f32.mrf.mxu1 }
 0x135   : > { %v1536_v20 = vpop.f32.mrf.mxu0 }
 0x136   : > { %v6375_v22 = vpop.f32.mrf.mxu1 }
 0x137   : > { %v5041_v25 = vpop.f32.mrf.mxu0 }
 0x138   : > { %v6377_v19 = vpop.f32.mrf.mxu1 }
 0x139   : > { %v6379_v3 = vpop.f32.mrf.mxu0 }
 0x13a   : > { %v6381_v28 = vpop.f32.mrf.mxu1 }
 0x13b   : > { %v6383_v60 = vpop.f32.mrf.mxu0 }
 0x13c   : > { %v6385_v26 = vpop.f32.mrf.mxu1 }
 0x13d   : > { %v6387_v11 = vpop.f32.mrf.mxu0 }
 0x13e   : > { %v6389_v43 = vpop.f32.mrf.mxu1 }
 0x13f   : > { %v5045_v55 = vpop.f32.mrf.mxu0 }
 0x140   : > { %v1602_v59 = vadd.f32 %v5045_v55, %v1392_v53  ;;  %v5073_v42 = vpop.f32.mrf.mxu1 }
 0x141   : > { %v1565_v56 = vpop.f32.mrf.mxu0 }
 0x142   : > { %v6391_v27 = vadd.f32 %v1565_v56, %v1390_v52  ;;  %v1796_v10 = vadd.f32 %v5073_v42, %v1602_v59  ;;  %v6393_v61 = vpop.f32.mrf.mxu1 }
 0x143   : > { %v5046_v44 = vpop.f32.mrf.mxu0 }
 0x144   : > { %v1603_v13 = vadd.f32 %v5046_v44, %v1393_v16  ;;  %v5074_v32 = vpop.f32.mrf.mxu1  ;;  %v938_v44 = vadd.f32 %v6295_v47, %v6290_v45 }
 0x145   : > { %v1568_v36 = vpop.f32.mrf.mxu0 }
 0x146   : > { %v6395_v37 = vadd.f32 %v1568_v36, %v1391_v1  ;;  %v1797_v38 = vadd.f32 %v5074_v32, %v1603_v13  ;;  %v6397_v39 = vpop.f32.mrf.mxu1  ;;  %v1384_v13 = vadd.f32 %v6337_v0, %v6335_v41  ;;  %v1382_v36 = vadd.f32 %v6342_v4, %v6340_v34 }
 0x147   : > { %6952 = vst [vmem:[#allocation6_spill] sm:$0xff] %v6397_v39  ;;  %v1195_v9 = vadd.f32 %v6355_v30, %v938_v44  ;;  %v942_v34 = vadd.f32 %v6311_v14, %v6306_v2  ;;  %v1388_v4 = vadd.f32 %v6361_v62, %v6359_v50  ;;  %v1389_v2 = vadd.f32 %v6369_v6, %v6367_v33 }
 0x148   : > { %v1594_v23 = vadd.f32 %v5037_v51, %v1384_v13 }
 0x149   : > { %v1383_v45 = vadd.f32 %v6357_v31, %v1195_v9  ;;  %v1199_v44 = vadd.f32 %v6371_v21, %v942_v34  ;;  %v2470_v34 = vstv %s6463_s22 }
 0x14a   : > { %v1788_v47 = vadd.f32 %v5065_v7, %v1594_v23  ;;  %v1386_v23 = vadd.f32 %v6365_v15, %v6363_v54  ;;  %v6446_v54 = vld [vmem:[%s6938_s3] ss:$0 sm:$0xff]  ;;  %vm6494_vm9 = vcmp.eq.s32.totalorder %v2470_v34, 1 }
 0x14b   : > { %v1593_v51 = vadd.f32 %v1536_v20, %v1383_v45  ;;  %v1387_v21 = vadd.f32 %v6373_v35, %v1199_v44 }
 0x14c   : > { %v1596_v7 = vadd.f32 %v6379_v3, %v1386_v23 }
 0x14d   : > { %v1787_v31 = vadd.f32 %v6375_v22, %v1593_v51  ;;  %v1597_v35 = vadd.f32 %v6387_v11, %v1387_v21 }
 0x14f   : > { %v5093_v40 = vpop.f32.mrf.mxu0  ;;  %v1791_v13 = vadd.f32 %v6389_v43, %v1597_v35 }
 0x150   : > { %v5121_v5 = vpop.f32.mrf.mxu1 }
 0x151   : > { %v1915_v48 = vpop.f32.mrf.mxu0 }
 0x152   : > { %v2125_v49 = vpop.f32.mrf.mxu1 }
 0x153   : > { %v5094_v53 = vpop.f32.mrf.mxu0 }
 0x154   : > { %v5122_v12 = vpop.f32.mrf.mxu1 }
 0x155   : > { %v1918_v57 = vpop.f32.mrf.mxu0 }
 0x156   : > { %v2128_v16 = vpop.f32.mrf.mxu1  ;;  %v1975_v6 = vadd.f32 %v1918_v57, %v1787_v31 }
 0x157   : > { %v5097_v52 = vpop.f32.mrf.mxu0 }
 0x158   : > { %v6405_v59 = vpop.f32.mrf.mxu1  ;;  %v2185_v11 = vadd.f32 %v2128_v16, %v1975_v6 }
 0x159   : > { %v6399_v63 = vpop.f32.mrf.mxu0 }
 0x15b   : > { %v6401_v58 = vpop.f32.mrf.mxu0 }
 0x15d   : > { %v6403_v55 = vpop.f32.mrf.mxu0 }
 0x15e   : > { %6953 = vst [vmem:[#allocation7_spill] sm:$0xff] %v6403_v55  ;;  %v6418_v55 = vpop.f32.mrf.mxu1 }
 0x15f   : > { %v5101_v1 = vpop.f32.mrf.mxu0 }
 0x160   : > { %v6407_v42 = vadd.f32 %v5101_v1, %v1796_v10  ;;  %v1385_v10 = vadd.f32 %v6352_v46, %v6350_v29  ;;  %v1592_v1 = vadd.f32 %v1533_v8, %v1382_v36  ;;  %v6425_v0 = vpop.f32.mrf.mxu1  ;;  %v1598_v46 = vadd.f32 %v5041_v25, %v1388_v4 }
 0x161   : > { %v6409_v56 = vpop.f32.mrf.mxu0 }
 0x162   : > { %v1595_v41 = vadd.f32 %v5038_v17, %v1385_v10  ;;  %v1786_v30 = vadd.f32 %v1727_v24, %v1592_v1  ;;  %v6432_v9 = vpop.f32.mrf.mxu1  ;;  %v1599_v24 = vadd.f32 %v6383_v60, %v1389_v2  ;;  %v1792_v15 = vadd.f32 %v6377_v19, %v1598_v46 }
 0x163   : > { %v5102_v32 = vpop.f32.mrf.mxu0 }
 0x164   : > { %v6420_v39 = vadd.f32 %v5102_v32, %v1797_v38  ;;  %v1976_v38 = vadd.f32 %v5093_v40, %v1788_v47  ;;  %v1789_v29 = vadd.f32 %v5066_v18, %v1595_v41  ;;  %v1974_v8 = vadd.f32 %v1915_v48, %v1786_v30  ;;  %v5129_v18 = vpop.f32.mrf.mxu1  ;;  %v6457_v40 = vld [vmem:[%s6939_s4] ss:$0 sm:$0xff]  ;;  %v6954_v41 = vld [vmem:[#allocation6_spill] sm:$0xff] }
 0x165   : > { %v1950_v14 = vpop.f32.mrf.mxu0  ;;  %v1980_v3 = vadd.f32 %v5097_v52, %v1792_v15  ;;  %v1793_v48 = vadd.f32 %v6385_v26, %v1599_v24  ;;  %v2466_v52 = vstv %s2465_s24  ;;  %v1794_v47 = vadd.f32 %v6393_v61, %v6391_v27  ;;  %v6957_v4 = vld [vmem:[#allocation7_spill] sm:$0xff]  ;;  %s6895_s24 = scalar_lea.vmem %s6943_s8, %s4228_s15 }
 0x166   : > { %v2186_v50 = vadd.f32 %v5121_v5, %v1976_v38  ;;  %v1977_v62 = vadd.f32 %v5094_v53, %v1789_v29  ;;  %v2184_v33 = vadd.f32 %v2125_v49, %v1974_v8  ;;  %v1790_v5 = vadd.f32 %v6381_v28, %v1596_v7  ;;  %v2157_v49 = vpop.f32.mrf.mxu1 }
 0x167   : > { %v1981_v36 = vadd.f32 %v6401_v58, %v1793_v48  ;;  %v2190_v10 = vadd.f32 %v6405_v59, %v1980_v3  ;;  %v1795_v43 = vadd.f32 %v6954_v41, %v6395_v37  ;;  %vm6477_vm6 = vcmp.eq.s32.totalorder %v2466_v52, 1 }
 0x168   : > { %v2187_v25 = vadd.f32 %v5122_v12, %v1977_v62  ;;  %v1978_v32 = vadd.f32 %v6399_v63, %v1790_v5  ;;  %v1979_v30 = vadd.f32 %v6957_v4, %v1791_v13  ;;  %v5130_v59 = vpop.f32.mrf.mxu1  ;;  %v1982_v61 = vadd.f32 %v6409_v56, %v1794_v47 }
 0x169   : > { %v2191_v27 = vadd.f32 %v6425_v0, %v1981_v36  ;;  %v2194_v56 = vadd.f32 %v5129_v18, %v6407_v42  ;;  %v2195_v35 = vadd.f32 %v5130_v59, %v6420_v39 }
 0x16a   : > { %v2188_v29 = vadd.f32 %v6418_v55, %v1978_v32  ;;  %v2189_v7 = vadd.f32 %v6432_v9, %v1979_v30  ;;  %v2160_v55 = vpop.f32.mrf.mxu1  ;;  %v2192_v15 = vadd.f32 %v2157_v49, %v1982_v61 }
 0x16f   : > { %v5149_v17 = vpop.f32.mrf.mxu0 }
 0x170   : > { %v2380_v20 = vadd.f32 %v5149_v17, %v2186_v50  ;;  %v1983_v50 = vadd.f32 %v1950_v14, %v1795_v43 }
 0x171   : > { %v2319_v22 = vpop.f32.mrf.mxu0 }
 0x172   : > { %v2423_v60 = vmul.f32 %v6446_v54, %v2380_v20  ;;  %v2378_v19 = vadd.f32 %v2319_v22, %v2184_v33  ;;  %v2193_v42 = vadd.f32 %v2160_v55, %v1983_v50 }
 0x173   : > { %v5150_v53 = vpop.f32.mrf.mxu0 }
 0x174   : > { %v2421_v57 = vmul.f32 %v6446_v54, %v2378_v19  ;;  %v2381_v12 = vadd.f32 %v5150_v53, %v2187_v25  ;;  %v2442_v28 = vadd.f32 %v6457_v40, %v2423_v60 }
 0x175   : > { %v2322_v26 = vpop.f32.mrf.mxu0 }
 0x176   : > { %v2440_v1 = vadd.f32 %v6457_v40, %v2421_v57  ;;  %v2424_v16 = vmul.f32 %v6446_v54, %v2381_v12  ;;  %v2379_v45 = vadd.f32 %v2322_v26, %v2185_v11  ;;  %v2454_v37 = vmax.f32 %v2442_v28, 0.0 }
 0x177   : > { %v5153_v58 = vpop.f32.mrf.mxu0 }
 0x178   : > { %v2443_v51 = vadd.f32 %v6457_v40, %v2424_v16  ;;  %v2422_v38 = vmul.f32 %v6446_v54, %v2379_v45  ;;  %v2384_v44 = vadd.f32 %v5153_v58, %v2190_v10  ;;  %v2452_v8 = vmax.f32 %v2440_v1, 0.0 }
 0x179   : > { %v2335_v46 = vpop.f32.mrf.mxu0 }
 0x17a   : > { %v2455_v23 = vmax.f32 %v2443_v51, 0.0  ;;  %v2441_v2 = vadd.f32 %v6457_v40, %v2422_v38  ;;  %v2427_v31 = vmul.f32 %v6446_v54, %v2384_v44  ;;  %v2382_v62 = vadd.f32 %v2335_v46, %v2188_v29 }
 0x17b   : > { %v5154_v21 = vpop.f32.mrf.mxu0  ;;  %v2476_v9 = vsel %vm6477_vm6, 0.0, %v2452_v8 }
 0x17c   : > { %v2489_v24 = vpack.c.bf16 %v2455_v23, %v2454_v37  ;;  %v2453_v0 = vmax.f32 %v2441_v2, 0.0  ;;  %v2385_v17 = vadd.f32 %v5154_v21, %v2191_v27  ;;  %v2446_v33 = vadd.f32 %v6457_v40, %v2427_v31  ;;  %v5515_v23 = vld [vmem:[%s6940_s5 + $0xb0] sm:$0xff]  }
 0x17d   : > { %v2425_v6 = vmul.f32 %v6446_v54, %v2382_v62  ;;  %v2338_v20 = vpop.f32.mrf.mxu0 }
 0x17e   : > { %v2502_v22 = vshrl.u32 %v2489_v24, 16  ;;  %v2477_v25 = vsel %vm6477_vm6, 0.0, %v2453_v0  ;;  %v2428_v60 = vmul.f32 %v6446_v54, %v2385_v17  ;;  %v2383_v19 = vadd.f32 %v2338_v20, %v2189_v7 }
 0x17f   : > { %v2488_v3 = vpack.c.bf16 %v2477_v25, %v2476_v9  ;;  %v5157_v5 = vpop.f32.mrf.mxu0  ;;  %v2505_v48 = vshll.u32 %v2489_v24, 16  ;;  %v2444_v53 = vadd.f32 %v6457_v40, %v2425_v6  ;;  %v2458_v49 = vmax.f32 %v2446_v33, 0.0  ;;  %v6962_v33 = vld [vmem:[#allocation4_spill] sm:$0xff]  ;;  %v5517_v9 = vld [vmem:[%s6940_s5 + $0xa8] sm:$0xff]  }
 0x180   : > { %v2504_v39 = vrot.slane %v2502_v22, 7  ;;  %v2388_v11 = vadd.f32 %v5157_v5, %v2194_v56  ;;  %v2447_v57 = vadd.f32 %v6457_v40, %v2428_v60  ;;  %v2426_v52 = vmul.f32 %v6446_v54, %v2383_v19 }
 0x181   : > { %v2351_v12 = vpop.f32.mrf.mxu0  ;;  %v2495_v13 = vshrl.u32 %v2488_v3, 16  ;;  %v2498_v26 = vshll.u32 %v2488_v3, 16  ;;  %v2456_v41 = vmax.f32 %v2444_v53, 0.0 }
 0x182   : > { %v6515_v32 = vsel %vm6505_vm10, %v2504_v39, 0  ;;  %v2431_v36 = vmul.f32 %v6446_v54, %v2388_v11  ;;  %v2386_v28 = vadd.f32 %v2351_v12, %v2192_v15  ;;  %v2459_v10 = vmax.f32 %v2447_v57, 0.0 }
 0x183   : > { %v2445_v1 = vadd.f32 %v6457_v40, %v2426_v52  ;;  %v5158_v16 = vpop.f32.mrf.mxu0  ;;  %v2497_v45 = vrot.slane %v2495_v13, 7  ;;  %v2507_v47 = vor.u32 %v2505_v48, %v2504_v39  ;;  %v2721_v51 = vshll.u32 %v6515_v32, 16 }
 0x184   : > { %v2450_v43 = vadd.f32 %v6457_v40, %v2431_v36  ;;  %v2429_v63 = vmul.f32 %v6446_v54, %v2386_v28  ;;  %v2389_v58 = vadd.f32 %v5158_v16, %v2195_v35  ;;  %v2491_v34 = vpack.c.bf16 %v2459_v10, %v2458_v49  ;;  %v5518_v28 = vld [vmem:[%s6940_s5 + $0xf0] sm:$0xff]  }
 0x185   : > { %v2457_v4 = vmax.f32 %v2445_v1, 0.0  ;;  %v2354_v30 = vpop.f32.mrf.mxu0  ;;  %v2500_v59 = vor.u32 %v2498_v26, %v2497_v45  ;;  %v6528_v8 = vsel %vm6505_vm10, 0, %v2507_v47  ;;  %v2723_v14 = vrot.slane %v2721_v51, 1  ;;  %v5519_v26 = vld [vmem:[%s6940_s5 + $0xa0] sm:$0xff]  }
 0x186   : > { %v2462_v38 = vmax.f32 %v2450_v43, 0.0  ;;  %v2448_v44 = vadd.f32 %v6457_v40, %v2429_v63  ;;  %v2432_v29 = vmul.f32 %v6446_v54, %v2389_v58  ;;  %v2387_v27 = vadd.f32 %v2354_v30, %v2193_v42  ;;  %v6963_v63 = vld [vmem:[#allocation5_spill] sm:$0xff] }
 0x187   : > { %v2516_v61 = vshrl.u32 %v2491_v34, 16  ;;  %v2490_v37 = vpack.c.bf16 %v2457_v4, %v2456_v41  ;;  %v2551_v46 = vsel %vm6505_vm10, 0, %v2500_v59  ;;  %v2519_v2 = vshll.u32 %v2491_v34, 16  ;;  %v5521_v59 = vld [vmem:[%s6940_s5 + $0x98] sm:$0xff]  }
 0x188   : > { %v2486_v31 = vsel %vm6494_vm9, 0.0, %v2462_v38  ;;  %v2451_v50 = vadd.f32 %v6457_v40, %v2432_v29  ;;  %v2430_v62 = vmul.f32 %v6446_v54, %v2387_v27  ;;  %5175 = vmatprep.mubr.bf16.mxu1 %v2551_v46  ;;  %v2460_v24 = vmax.f32 %v2448_v44, 0.0  ;;  %v5520_v38 = vld [vmem:[%s6940_s5 + $0xe8] sm:$0xff]  }
 0x189   : > { %v2518_v21 = vrot.slane %v2516_v61, 7  ;;  %v2509_v7 = vshrl.u32 %v2490_v37, 16  ;;  %v2512_v55 = vshll.u32 %v2490_v37, 16  ;;  %5176 = vmatmul.mubr.bf16.vlgmr.msra.gmra.mxu1 %v6528_v8  ;;  %v2702_v56 = vshrl.u32 %v2551_v46, 16 }
 0x18a   : > { %v2463_v0 = vmax.f32 %v2451_v50, 0.0  ;;  %v2449_v17 = vadd.f32 %v6457_v40, %v2430_v62  ;;  %v2704_v15 = vshll.u32 %v2551_v46, 16  ;;  %5208 = vmatpush3.bf16.msra.mxu1 %v6962_v33  ;;  %v2714_v20 = vshrl.u32 %v6528_v8, 16  ;;  %v5522_v62 = vld [vmem:[%s6940_s5 + $0xe0] sm:$0xff]  }
 0x18b   : > { %v2511_v6 = vrot.slane %v2509_v7, 7  ;;  %v2716_v35 = vshll.u32 %v6528_v8, 16  ;;  %5209 = vmatprep.subr.bf16.mxu1 %v5515_v23  ;;  %v2557_v54 = vsel %vm6505_vm10, %v2497_v45, 0  ;;  %v2521_v5 = vor.u32 %v2519_v2, %v2518_v21 }
 0x18c   : > { %v2487_v40 = vsel %vm6494_vm9, 0.0, %v2463_v0  ;;  %v2461_v22 = vmax.f32 %v2449_v17, 0.0  ;;  %v2706_v25 = vrot.slane %v2704_v15, 1  ;;  %v2709_v42 = vshll.u32 %v2557_v54, 16 }
 0x18d   : > { %v6549_v3 = vpack.c.bf16 %v2487_v40, %v2486_v31  ;;  %v2514_v60 = vor.u32 %v2512_v55, %v2511_v6  ;;  %v2718_v19 = vrot.slane %v2716_v35, 1  ;;  %v2916_v11 = vrot.slane %v2551_v46, 1 }
 0x18e   : > { %v2492_v39 = vpack.c.bf16 %v2461_v22, %v2460_v24  ;;  %5210 = vmatpush3.bf16.msra.mxu1 %v5515_v23  ;;  %v2707_v48 = vor.u32 %v2706_v25, %v2702_v56  ;;  %v2711_v53 = vrot.slane %v2709_v42, 1  ;;  %v6557_v52 = vsel %vm6505_vm10, 0, %v2521_v5 }
 0x18f   : > { %v6553_v49 = vsel %vm6505_vm10, 0, %v2514_v60  ;;  %v2719_v57 = vor.u32 %v2718_v19, %v2714_v20  ;;  %5211 = vmatprep.subr.bf16.mxu1 %v5517_v9  ;;  %v2917_v36 = vrot.slane %v2557_v54, 1  ;;  %v6569_v10 = vsel %vm6505_vm10, %v2511_v6, 0  ;;  %v5525_v6 = vld [vmem:[%s6940_s5 + $0x88] sm:$0xff]   ;;  %v5527_v60 = vld [vmem:[%s6940_s5 + $0x80] sm:$0xff]  }
 0x190   : > { %v2523_v12 = vshrl.u32 %v2492_v39, 16  ;;  %5179 = vmatprep.mubr.bf16.mxu1 %v6553_v49  ;;  %v2712_v13 = vsel %vm2700_vm11, %v2707_v48, %v2711_v53  ;;  %v2728_v16 = vshll.u32 %v6553_v49, 16  ;;  %v2733_v41 = vshll.u32 %v6569_v10, 16  ;;  %v5526_v48 = vld [vmem:[%s6940_s5 + $0xd0] sm:$0xff]  }
 0x191   : > { %5199 = vmatprep.mubr.bf16.mxu0 %v2712_v13  ;;  %v6572_v1 = vsel %vm2700_vm11, %v2719_v57, %v2723_v14  ;;  %5180 = vmatmul.mubr.bf16.gmra.mxu1 %v6557_v52  ;;  %v2918_v47 = vsel %vm2915_vm12, %v2916_v11, %v2917_v36  ;;  %v6581_v43 = vsel %vm6505_vm10, %v2518_v21, 0  ;;  %v2726_v58 = vshrl.u32 %v6553_v49, 16  ;;  %v5523_v21 = vld [vmem:[%s6940_s5 + $0x90] sm:$0xff]  }
 0x192   : > { %v2525_v45 = vrot.slane %v2523_v12, 7  ;;  %5200 = vmatmul.mubr.bf16.vlgmr.msra.gmra.mxu0 %v6572_v1  ;;  %5212 = vmatpush3.bf16.msra.mxu1 %v5517_v9  ;;  %v2730_v34 = vrot.slane %v2728_v16, 1  ;;  %v2740_v4 = vshll.u32 %v6557_v52, 16  ;;  %v2745_v30 = vshll.u32 %v6581_v43, 16  ;;  %v5524_v9 = vld [vmem:[%s6940_s5 + $0xd8] sm:$0xff]  }
 0x193   : > { %5232 = vmatpush3.bf16.msra.mxu0 %v6963_v63  ;;  %5223 = vmatprep.mubr.bf16.mxu1 %v2918_v47  ;;  %v2526_v51 = vshll.u32 %v2492_v39, 16  ;;  %v2735_v29 = vrot.slane %v2733_v41, 1  ;;  %v2738_v27 = vshrl.u32 %v6557_v52, 16  ;;  %v2530_v50 = vshrl.u32 %v6549_v3, 16  ;;  %v5529_v12 = vld [vmem:[%s6940_s5 + $0x138] sm:$0xff]   ;;  %v5531_v63 = vld [vmem:[%s6940_s5 + $0x130] sm:$0xff]  }
 0x194   : > { %5233 = vmatprep.subr.bf16.mxu0 %v5518_v28  ;;  %5213 = vmatprep.subr.bf16.mxu1 %v5519_v26  ;;  %v2731_v44 = vor.u32 %v2730_v34, %v2726_v58  ;;  %v2742_v61 = vrot.slane %v2740_v4, 1  ;;  %v2747_v37 = vrot.slane %v2745_v30, 1  ;;  %v2561_v31 = vsel %vm6505_vm10, %v2525_v45, 0 }
 0x195   : > { %v2528_v46 = vor.u32 %v2526_v51, %v2525_v45  ;;  %v3248_v55 = vshll.u32 %v2561_v31, 16  ;;  %v3410_v56 = vrot.slane %v2561_v31, 1  ;;  %v2532_v15 = vrot.slane %v2530_v50, 7  ;;  %v5534_v51 = vld [vmem:[%s6940_s5 + $0x170] sm:$0xff]   ;;  %v5544_v31 = vld [vmem:[%s6940_s5 + $0x148] sm:$0xff]  }
 0x196   : > { %5214 = vmatpush3.bf16.msra.mxu1 %v5519_v26  ;;  %v6595_v23 = vsel %vm2700_vm11, %v2731_v44, %v2735_v29  ;;  %v2743_v2 = vor.u32 %v2742_v61, %v2738_v27  ;;  %v2533_v33 = vshll.u32 %v6549_v3, 16  ;;  %v2919_v26 = vrot.slane %v6528_v8, 1  ;;  %v5536_v44 = vld [vmem:[%s6940_s5 + $0x168] sm:$0xff]   ;;  %v5538_v29 = vld [vmem:[%s6940_s5 + $0x160] sm:$0xff]   ;;  %v5539_v27 = vld [vmem:[%s6940_s5 + $0x110] sm:$0xff]  }
 0x197   : > { %5234 = vmatpush3.bf16.msra.mxu0 %v5518_v28  ;;  %5215 = vmatprep.subr.bf16.mxu1 %v5521_v59  ;;  %v6609_v7 = vsel %vm6505_vm10, 0, %v2528_v46  ;;  %v2562_v22 = vsel %vm6505_vm10, %v2532_v15, 0  ;;  %v3250_v42 = vrot.slane %v3248_v55, 1  ;;  %v5528_v28 = vld [vmem:[%s6940_s5 + $0xc8] sm:$0xff]   ;;  %v2922_v16 = vrot.slane %v6553_v49, 1  ;;  %v5540_v61 = vld [vmem:[%s6940_s5 + $0x158] sm:$0xff]  }
 0x198   : > { %5203 = vmatprep.mubr.bf16.mxu0 %v6595_v23  ;;  %5235 = vmatprep.subr.bf16.mxu0 %v5520_v38  ;;  %v6612_v24 = vsel %vm2700_vm11, %v2743_v2, %v2747_v37  ;;  %v3243_v0 = vshll.u32 %v6609_v7, 16  ;;  %v3409_v17 = vrot.slane %v6609_v7, 1  ;;  %v3241_v20 = vshrl.u32 %v6609_v7, 16  ;;  %v5543_v37 = vld [vmem:[%s6940_s5 + $0x100] sm:$0xff]   ;;  %v5542_v46 = vld [vmem:[%s6940_s5 + $0x150] sm:$0xff]   ;;  %v5545_v2 = vld [vmem:[%s6940_s5 + $0x1b8] sm:$0xff]  }
 0x199   : > { %v2535_v40 = vor.u32 %v2533_v33, %v2532_v15  ;;  %v3729_v39 = vshll.u32 %v2562_v22, 16  ;;  %v3891_v53 = vrot.slane %v2562_v22, 1  ;;  %v2920_v47 = vrot.slane %v6515_v32, 1  ;;  %v5533_v32 = vld [vmem:[%s6940_s5 + $0x128] sm:$0xff]   ;;  %v5547_v50 = vld [vmem:[%s6940_s5 + $0x1b0] sm:$0xff]   ;;  %v5548_v55 = vld [vmem:[%s6940_s5 + $0x1f8] sm:$0xff]  }
 0x19a   : > { %5204 = vmatmul.mubr.bf16.gmra.mxu0 %v6612_v24  ;;  %5216 = vmatpush3.bf16.msra.mxu1 %v5521_v59  ;;  %v3245_v35 = vrot.slane %v3243_v0, 1  ;;  %v6624_v54 = vsel %vm2915_vm12, %v3409_v17, %v3410_v56  ;;  %v2923_v41 = vrot.slane %v6569_v10, 1  ;;  %v5532_v10 = vld [vmem:[%s6940_s5 + $0x178] sm:$0xff]   ;;  %v2925_v4 = vrot.slane %v6557_v52, 1  ;;  %v5550_v0 = vld [vmem:[%s6940_s5 + $0x1f0] sm:$0xff]   ;;  %v5551_v17 = vld [vmem:[%s6940_s5 + $0x1a0] sm:$0xff]  }
 0x19b   : > { %5236 = vmatpush3.bf16.msra.mxu0 %v5520_v38  ;;  %5247 = vmatprep.mubr.bf16.mxu0 %v6528_v8  ;;  %v6633_v3 = vsel %vm6505_vm10, 0, %v2535_v40  ;;  %v3731_v36 = vrot.slane %v3729_v39, 1  ;;  %v2921_v58 = vsel %vm2915_vm12, %v2919_v26, %v2920_v47  ;;  %v5530_v8 = vld [vmem:[%s6940_s5 + $0xc0] sm:$0xff]   ;;  %v2926_v30 = vrot.slane %v6581_v43, 1  ;;  %v5537_v43 = vld [vmem:[%s6940_s5 + $0x118] sm:$0xff]   ;;  %v5552_v15 = vld [vmem:[%s6940_s5 + $0x1e8] sm:$0xff]  }
 0x19c   : > { %5237 = vmatprep.subr.bf16.mxu0 %v5522_v62  ;;  %5217 = vmatprep.subr.bf16.mxu1 %v5523_v21  ;;  %v3246_v25 = vor.u32 %v3245_v35, %v3241_v20  ;;  %v3724_v5 = vshll.u32 %v6633_v3, 16  ;;  %v3890_v18 = vrot.slane %v6633_v3, 1  ;;  %v3722_v11 = vshrl.u32 %v6633_v3, 16  ;;  %v5535_v38 = vld [vmem:[%s6940_s5 + $0x120] sm:$0xff]   ;;  %v5553_v56 = vld [vmem:[%s6940_s5 + $0x198] sm:$0xff]   ;;  %v5560_v40 = vld [vmem:[%s6940_s5 + $0x1c8] sm:$0xff]  }
 0x19d   : > { %v6671_v34 = vsel %vm2915_vm12, %v2922_v16, %v2923_v41  ;;  %v6683_v59 = vsel %vm2915_vm12, %v2925_v4, %v2926_v30  ;;  %v5554_v33 = vld [vmem:[%s6940_s5 + $0x1e0] sm:$0xff]   ;;  %v5556_v20 = vld [vmem:[%s6940_s5 + $0x1d8] sm:$0xff]   ;;  %v5563_v22 = vld [vmem:[%s6940_s5 + $0x230] sm:$0xff]  }
 0x19e   : > { %5218 = vmatpush3.bf16.msra.mxu1 %v5523_v21  ;;  %v6639_v19 = vsel %vm2700_vm11, %v3246_v25, %v3250_v42  ;;  %v3726_v57 = vrot.slane %v3724_v5, 1  ;;  %v6648_v14 = vsel %vm2915_vm12, %v3890_v18, %v3891_v53  ;;  %v5549_v21 = vld [vmem:[%s6940_s5 + $0x1a8] sm:$0xff]   ;;  %v5559_v35 = vld [vmem:[%s6940_s5 + $0x180] sm:$0xff]  }
 0x19f   : > { %5238 = vmatpush3.bf16.msra.mxu0 %v5522_v62  ;;  %5219 = vmatprep.subr.bf16.mxu1 %v5525_v6  ;;  %v5546_v62 = vld [vmem:[%s6940_s5 + $0x140] sm:$0xff]   ;;  %v5564_v42 = vld [vmem:[%s6940_s5 + $0x228] sm:$0xff]  }
 0x1a0   : > { %5239 = vmatprep.subr.bf16.mxu0 %v5524_v9  ;;  %v3727_v13 = vor.u32 %v3726_v57, %v3722_v11  ;;  %v5562_v25 = vld [vmem:[%s6940_s5 + $0x1c0] sm:$0xff]  }
 0x1a2   : > { %5220 = vmatpush3.bf16.msra.mxu1 %v5525_v6  ;;  %v6659_v45 = vsel %vm2700_vm11, %v3727_v13, %v3731_v36  ;;  %v5555_v6 = vld [vmem:[%s6940_s5 + $0x190] sm:$0xff]  }
 0x1a3   : > { %5240 = vmatpush3.bf16.msra.mxu0 %v5524_v9  ;;  %5221 = vmatprep.subr.bf16.mxu1 %v5527_v60  ;;  %v5561_v9 = vld [vmem:[%s6940_s5 + $0x238] sm:$0xff]  }
 0x1a4   : > { %5241 = vmatprep.subr.bf16.mxu0 %v5526_v48 }
 0x1a6   : > { %5222 = vmatpush3.bf16.msra.mxu1 %v5527_v60  ;;  %v5565_v60 = vld [vmem:[%s6940_s5 + $0x220] sm:$0xff]  }
 0x1a7   : > { %5242 = vmatpush3.bf16.msra.mxu0 %v5526_v48  ;;  %5255 = vmatprep.subr.bf16.mxu1 %v5529_v12 }
 0x1a8   : > { %5243 = vmatprep.subr.bf16.mxu0 %v5528_v28 }
 0x1a9   : > { %5224 = vmatmul.mubr.bf16.vlgmr.msra.gmra.mxu1 %v2921_v58 }
 0x1aa   : > { %5227 = vmatprep.mubr.bf16.mxu1 %v6671_v34  ;;  %5256 = vmatpush3.bf16.msra.mxu1 %v5529_v12 }
 0x1ab   : > { %5244 = vmatpush3.bf16.msra.mxu0 %v5528_v28  ;;  %5257 = vmatprep.subr.bf16.mxu1 %v5531_v63 }
 0x1ac   : > { %5245 = vmatprep.subr.bf16.mxu0 %v5530_v8 }
 0x1ae   : > { %5258 = vmatpush3.bf16.msra.mxu1 %v5531_v63 }
 0x1af   : > { %5246 = vmatpush3.bf16.msra.mxu0 %v5530_v8  ;;  %5259 = vmatprep.subr.bf16.mxu1 %v5533_v32 }
 0x1b0   : > { %5279 = vmatprep.subr.bf16.mxu0 %v5532_v10 }
 0x1b1   : > { %5228 = vmatmul.mubr.bf16.gmra.mxu1 %v6683_v59 }
 0x1b2   : > { %5248 = vmatmul.mubr.bf16.vlgmr.msra.gmra.mxu0 %v6553_v49  ;;  %5260 = vmatpush3.bf16.msra.mxu1 %v5533_v32 }
 0x1b3   : > { %5251 = vmatprep.mubr.bf16.mxu0 %v6557_v52  ;;  %5280 = vmatpush3.bf16.msra.mxu0 %v5532_v10 }
 0x1b4   : > { %5271 = vmatprep.mubr.bf16.mxu1 %v6572_v1  ;;  %5281 = vmatprep.subr.bf16.mxu0 %v5534_v51  ;;  %v5541_v1 = vld [vmem:[%s6940_s5 + $0x108] sm:$0xff]  }
 0x1b5   : > { %5261 = vmatprep.subr.bf16.mxu1 %v5535_v38 }
 0x1b6   : > { %5262 = vmatpush3.bf16.msra.mxu1 %v5535_v38 }
 0x1b7   : > { %5282 = vmatpush3.bf16.msra.mxu0 %v5534_v51  ;;  %5263 = vmatprep.subr.bf16.mxu1 %v5537_v43 }
 0x1b8   : > { %5283 = vmatprep.subr.bf16.mxu0 %v5536_v44 }
 0x1ba   : > { %5252 = vmatmul.mubr.bf16.gmra.mxu0 %v6609_v7  ;;  %5264 = vmatpush3.bf16.msra.mxu1 %v5537_v43 }
 0x1bb   : > { %5284 = vmatpush3.bf16.msra.mxu0 %v5536_v44  ;;  %5295 = vmatprep.mubr.bf16.mxu0 %v2921_v58 }
 0x1bc   : > { %5285 = vmatprep.subr.bf16.mxu0 %v5538_v29  ;;  %5265 = vmatprep.subr.bf16.mxu1 %v5539_v27 }
 0x1be   : > { %5266 = vmatpush3.bf16.msra.mxu1 %v5539_v27 }
 0x1bf   : > { %5286 = vmatpush3.bf16.msra.mxu0 %v5538_v29  ;;  %5267 = vmatprep.subr.bf16.mxu1 %v5541_v1 }
 0x1c0   : > { %5287 = vmatprep.subr.bf16.mxu0 %v5540_v61 }
 0x1c2   : > { %5268 = vmatpush3.bf16.msra.mxu1 %v5541_v1 }
 0x1c3   : > { %5288 = vmatpush3.bf16.msra.mxu0 %v5540_v61  ;;  %5269 = vmatprep.subr.bf16.mxu1 %v5543_v37 }
 0x1c4   : > { %5289 = vmatprep.subr.bf16.mxu0 %v5542_v46 }
 0x1c6   : > { %5270 = vmatpush3.bf16.msra.mxu1 %v5543_v37 }
 0x1c7   : > { %5290 = vmatpush3.bf16.msra.mxu0 %v5542_v46  ;;  %5303 = vmatprep.subr.bf16.mxu1 %v5545_v2 }
 0x1c8   : > { %5291 = vmatprep.subr.bf16.mxu0 %v5544_v31 }
 0x1c9   : > { %5272 = vmatmul.mubr.bf16.vlgmr.msra.gmra.mxu1 %v6595_v23 }
 0x1ca   : > { %5275 = vmatprep.mubr.bf16.mxu1 %v6612_v24  ;;  %5304 = vmatpush3.bf16.msra.mxu1 %v5545_v2 }
 0x1cb   : > { %5292 = vmatpush3.bf16.msra.mxu0 %v5544_v31  ;;  %5305 = vmatprep.subr.bf16.mxu1 %v5547_v50 }
 0x1cc   : > { %5293 = vmatprep.subr.bf16.mxu0 %v5546_v62 }
 0x1ce   : > { %5306 = vmatpush3.bf16.msra.mxu1 %v5547_v50 }
 0x1cf   : > { %5294 = vmatpush3.bf16.msra.mxu0 %v5546_v62  ;;  %5307 = vmatprep.subr.bf16.mxu1 %v5549_v21 }
 0x1d0   : > { %5327 = vmatprep.subr.bf16.mxu0 %v5548_v55 }
 0x1d1   : > { %5276 = vmatmul.mubr.bf16.gmra.mxu1 %v6639_v19 }
 0x1d2   : > { %5296 = vmatmul.mubr.bf16.vlgmr.msra.gmra.mxu0 %v6671_v34  ;;  %5308 = vmatpush3.bf16.msra.mxu1 %v5549_v21 }
 0x1d3   : > { %5299 = vmatprep.mubr.bf16.mxu0 %v6683_v59  ;;  %5328 = vmatpush3.bf16.msra.mxu0 %v5548_v55 }
 0x1d4   : > { %5319 = vmatprep.mubr.bf16.mxu1 %v6553_v49  ;;  %5329 = vmatprep.subr.bf16.mxu0 %v5550_v0  ;;  %v5557_v49 = vld [vmem:[%s6940_s5 + $0x188] sm:$0xff]  }
 0x1d5   : > { %5309 = vmatprep.subr.bf16.mxu1 %v5551_v17 }
 0x1d6   : > { %5310 = vmatpush3.bf16.msra.mxu1 %v5551_v17 }
 0x1d7   : > { %5330 = vmatpush3.bf16.msra.mxu0 %v5550_v0  ;;  %5311 = vmatprep.subr.bf16.mxu1 %v5553_v56 }
 0x1d8   : > { %5331 = vmatprep.subr.bf16.mxu0 %v5552_v15 }
 0x1da   : > { %5300 = vmatmul.mubr.bf16.gmra.mxu0 %v6624_v54  ;;  %5312 = vmatpush3.bf16.msra.mxu1 %v5553_v56 }
 0x1db   : > { %5332 = vmatpush3.bf16.msra.mxu0 %v5552_v15  ;;  %5343 = vmatprep.mubr.bf16.mxu0 %v6595_v23  ;;  %v5558_v23 = vld [vmem:[%s6940_s5 + $0x1d0] sm:$0xff]  }
 0x1dc   : > { %5333 = vmatprep.subr.bf16.mxu0 %v5554_v33  ;;  %5313 = vmatprep.subr.bf16.mxu1 %v5555_v6 }
 0x1de   : > { %5314 = vmatpush3.bf16.msra.mxu1 %v5555_v6 }
 0x1df   : > { %5334 = vmatpush3.bf16.msra.mxu0 %v5554_v33  ;;  %5315 = vmatprep.subr.bf16.mxu1 %v5557_v49 }
 0x1e0   : > { %5335 = vmatprep.subr.bf16.mxu0 %v5556_v20 }
 0x1e2   : > { %5316 = vmatpush3.bf16.msra.mxu1 %v5557_v49 }
 0x1e3   : > { %5336 = vmatpush3.bf16.msra.mxu0 %v5556_v20  ;;  %5317 = vmatprep.subr.bf16.mxu1 %v5559_v35 }
 0x1e4   : > { %5337 = vmatprep.subr.bf16.mxu0 %v5558_v23 }
 0x1e6   : > { %5318 = vmatpush3.bf16.msra.mxu1 %v5559_v35 }
 0x1e7   : > { %5338 = vmatpush3.bf16.msra.mxu0 %v5558_v23  ;;  %5351 = vmatprep.subr.bf16.mxu1 %v5561_v9 }
 0x1e8   : > { %5339 = vmatprep.subr.bf16.mxu0 %v5560_v40 }
 0x1e9   : > { %5320 = vmatmul.mubr.bf16.vlgmr.msra.gmra.mxu1 %v6557_v52  ;;  %v5566_v52 = vld [vmem:[%s6940_s5 + $0x218] sm:$0xff]  }
 0x1ea   : > { %5323 = vmatprep.mubr.bf16.mxu1 %v6609_v7  ;;  %5352 = vmatpush3.bf16.msra.mxu1 %v5561_v9  ;;  %v5567_v7 = vld [vmem:[%s6940_s5 + $0x210] sm:$0xff]  }
 0x1eb   : > { %5340 = vmatpush3.bf16.msra.mxu0 %v5560_v40  ;;  %5353 = vmatprep.subr.bf16.mxu1 %v5563_v22 }
 0x1ec   : > { %5341 = vmatprep.subr.bf16.mxu0 %v5562_v25 }
 0x1ee   : > { %5354 = vmatpush3.bf16.msra.mxu1 %v5563_v22 }
 0x1ef   : > { %5342 = vmatpush3.bf16.msra.mxu0 %v5562_v25  ;;  %5355 = vmatprep.subr.bf16.mxu1 %v5564_v42 }
 0x1f1   : > { %5324 = vmatmul.mubr.bf16.gmra.mxu1 %v6633_v3  ;;  %v5569_v3 = vld [vmem:[%s6940_s5 + $0x200] sm:$0xff]  }
 0x1f2   : > { %5344 = vmatmul.mubr.bf16.vlgmr.msra.gmra.mxu0 %v6612_v24  ;;  %5356 = vmatpush3.bf16.msra.mxu1 %v5564_v42  ;;  %v5568_v24 = vld [vmem:[%s6940_s5 + $0x208] sm:$0xff]  }
 0x1f3   : > { %5347 = vmatprep.mubr.bf16.mxu0 %v6639_v19  ;;  %5367 = vmatprep.mubr.bf16.mxu1 %v6671_v34 }
 0x1f4   : > { %5357 = vmatprep.subr.bf16.mxu1 %v5565_v60 }
 0x1f6   : > { %5358 = vmatpush3.bf16.msra.mxu1 %v5565_v60 }
 0x1f7   : > { %5359 = vmatprep.subr.bf16.mxu1 %v5566_v52 }
 0x1fa   : > { %5348 = vmatmul.mubr.bf16.gmra.mxu0 %v6659_v45  ;;  %5360 = vmatpush3.bf16.msra.mxu1 %v5566_v52 }
 0x1fb   : > { %5361 = vmatprep.subr.bf16.mxu1 %v5567_v7 }
 0x1fe   : > { %5362 = vmatpush3.bf16.msra.mxu1 %v5567_v7 }
 0x1ff   : > { %5363 = vmatprep.subr.bf16.mxu1 %v5568_v24 }
 0x202   : > { %5364 = vmatpush3.bf16.msra.mxu1 %v5568_v24 }
 0x203   : > { %5365 = vmatprep.subr.bf16.mxu1 %v5569_v3 }
 0x206   : > { %5366 = vmatpush3.bf16.msra.mxu1 %v5569_v3 }
 0x209   : > { %5368 = vmatmul.mubr.bf16.vlgmr.msra.gmra.mxu1 %v6683_v59 }
 0x20a   : > { %5371 = vmatprep.mubr.bf16.mxu1 %v6624_v54 }
 0x211   : > { %5372 = vmatmul.mubr.bf16.gmra.mxu1 %v6648_v14 }
 0x249   : > { %v5177_v19 = vpop.f32.mrf.mxu1 }
 0x24b   : > { %v2661_v5 = vpop.f32.mrf.mxu1 }
 0x24d   : > { %v5178_v39 = vpop.f32.mrf.mxu1 }
 0x24f   : > { %v2664_v18 = vpop.f32.mrf.mxu1 }
 0x251   : > { %v5181_v11 = vpop.f32.mrf.mxu1 }
 0x252   : > { %v5201_v48 = vpop.f32.mrf.mxu0 }
 0x253   : > { %v6816_v12 = vpop.f32.mrf.mxu1  ;;  %v2893_v40 = vadd.f32 %v5201_v48, %v5177_v19 }
 0x254   : > { %v2852_v53 = vpop.f32.mrf.mxu0 }
 0x255   : > { %v6818_v36 = vpop.f32.mrf.mxu1  ;;  %v2891_v22 = vadd.f32 %v2852_v53, %v2661_v5 }
 0x256   : > { %v5202_v57 = vpop.f32.mrf.mxu0 }
 0x257   : > { %v6820_v26 = vpop.f32.mrf.mxu1  ;;  %v2894_v52 = vadd.f32 %v5202_v57, %v5178_v39 }
 0x258   : > { %v2855_v13 = vpop.f32.mrf.mxu0 }
 0x259   : > { %v2892_v3 = vadd.f32 %v2855_v13, %v2664_v18 }
 0x25a   : > { %v5205_v28 = vpop.f32.mrf.mxu0 }
 0x25c   : > { %v2868_v54 = vpop.f32.mrf.mxu0 }
 0x25d   : > { %v2895_v53 = vadd.f32 %v2868_v54, %v6816_v12 }
 0x25e   : > { %v6822_v14 = vpop.f32.mrf.mxu0 }
 0x260   : > { %v6824_v41 = vpop.f32.mrf.mxu0 }
 0x261   : > { %v2896_v12 = vadd.f32 %v6824_v41, %v6820_v26 }
 0x269   : > { %v5225_v16 = vpop.f32.mrf.mxu1 }
 0x26a   : > { %v3072_v25 = vadd.f32 %v5225_v16, %v2893_v40 }
 0x26b   : > { %v3031_v45 = vpop.f32.mrf.mxu1 }
 0x26c   : > { %v3070_v7 = vadd.f32 %v3031_v45, %v2891_v22 }
 0x26d   : > { %v5226_v47 = vpop.f32.mrf.mxu1 }
 0x26f   : > { %v3034_v58 = vpop.f32.mrf.mxu1 }
 0x271   : > { %v5229_v34 = vpop.f32.mrf.mxu1 }
 0x272   : > { %v5249_v63 = vpop.f32.mrf.mxu0 }
 0x273   : > { %v3047_v10 = vpop.f32.mrf.mxu1  ;;  %v3226_v24 = vadd.f32 %v5249_v63, %v3072_v25 }
 0x274   : > { %v3185_v8 = vpop.f32.mrf.mxu0 }
 0x275   : > { %v6826_v30 = vpop.f32.mrf.mxu1 }
 0x276   : > { %v5250_v32 = vpop.f32.mrf.mxu0 }
 0x277   : > { %v6828_v51 = vpop.f32.mrf.mxu1 }
 0x278   : > { %v3188_v4 = vpop.f32.mrf.mxu0  ;;  %v3075_v26 = vadd.f32 %v6828_v51, %v2896_v12 }
 0x27a   : > { %v5253_v59 = vpop.f32.mrf.mxu0 }
 0x27c   : > { %v6830_v43 = vpop.f32.mrf.mxu0 }
 0x27e   : > { %v6832_v29 = vpop.f32.mrf.mxu0 }
 0x280   : > { %v6834_v1 = vpop.f32.mrf.mxu0 }
 0x281   : > { %6964 = vst [vmem:[#allocation6_spill] sm:$0xff] %v6834_v1 }
 0x289   : > { %v5273_v38 = vpop.f32.mrf.mxu1 }
 0x28b   : > { %v3352_v44 = vpop.f32.mrf.mxu1 }
 0x28d   : > { %v5274_v27 = vpop.f32.mrf.mxu1 }
 0x28f   : > { %v3355_v37 = vpop.f32.mrf.mxu1 }
 0x291   : > { %v5277_v2 = vpop.f32.mrf.mxu1 }
 0x292   : > { %v5297_v61 = vpop.f32.mrf.mxu0 }
 0x293   : > { %v6836_v50 = vpop.f32.mrf.mxu1 }
 0x294   : > { %v3512_v46 = vpop.f32.mrf.mxu0 }
 0x295   : > { %v6838_v21 = vpop.f32.mrf.mxu1 }
 0x296   : > { %v5298_v31 = vpop.f32.mrf.mxu0  ;;  %6965 = vst [vmem:[#allocation7_spill] sm:$0xff] %v6838_v21  ;;  %v2897_v21 = vadd.f32 %v5205_v28, %v5181_v11  ;;  %v3074_v11 = vadd.f32 %v3047_v10, %v2895_v53 }
 0x297   : > { %v6842_v0 = vpop.f32.mrf.mxu1 }
 0x298   : > { %v3515_v62 = vpop.f32.mrf.mxu0  ;;  %6966 = vst [vmem:[#allocation4_spill] sm:$0xff] %v6842_v0  ;;  %v3073_v0 = vadd.f32 %v5226_v47, %v2894_v52  ;;  %v3076_v16 = vadd.f32 %v5229_v34, %v2897_v21  ;;  %v2898_v47 = vadd.f32 %v6822_v14, %v6818_v36  ;;  %v3228_v34 = vadd.f32 %v6830_v43, %v3074_v11  ;;  %v6870_v36 = vld [vmem:[%s6941_s6] ss:$0 sm:$0xff] }
 0x29a   : > { %v6840_v55 = vpop.f32.mrf.mxu0  ;;  %v3227_v19 = vadd.f32 %v5250_v32, %v3073_v0  ;;  %v3230_v28 = vadd.f32 %v5253_v59, %v3076_v16  ;;  %v3077_v54 = vadd.f32 %v6826_v30, %v2898_v47  ;;  %v3395_v30 = vadd.f32 %v6836_v50, %v3228_v34  ;;  %v6971_v0 = vld [vmem:[#allocation6_spill] sm:$0xff] }
 0x29b   : > { %v3229_v51 = vadd.f32 %v6971_v0, %v3075_v26 }
 0x29c   : > { %v6844_v56 = vpop.f32.mrf.mxu0  ;;  %v3394_v57 = vadd.f32 %v5274_v27, %v3227_v19  ;;  %v3231_v41 = vadd.f32 %v6832_v29, %v3077_v54 }
 0x29d   : > { %6967 = vst [vmem:[#allocation5_spill] sm:$0xff] %v6844_v56  ;;  %v3393_v56 = vadd.f32 %v5273_v38, %v3226_v24 }
 0x29e   : > { %v6846_v33 = vpop.f32.mrf.mxu0 }
 0x29f   : > { %6968 = vst [vmem:[#allocation8_spill] sm:$0xff] %v6846_v33  ;;  %v3224_v33 = vadd.f32 %v3185_v8, %v3070_v7  ;;  %v3553_v48 = vadd.f32 %v5297_v61, %v3393_v56  ;;  %v3554_v8 = vadd.f32 %v5298_v31, %v3394_v57  ;;  %v6975_v40 = vld [vmem:[#allocation4_spill] sm:$0xff] }
 0x2a0   : > { %v6848_v49 = vpop.f32.mrf.mxu0  ;;  %v3396_v22 = vadd.f32 %v6975_v40, %v3229_v51 }
 0x2a1   : > { %6969 = vst [vmem:[#allocation9_spill] sm:$0xff] %v6848_v49  ;;  %v3391_v5 = vadd.f32 %v3352_v44, %v3224_v33 }
 0x2a3   : > { %v3551_v45 = vadd.f32 %v3512_v46, %v3391_v5 }
 0x2a4   : > { %v6973_v56 = vld [vmem:[#allocation5_spill] sm:$0xff] }
 0x2a5   : > { %v3555_v50 = vadd.f32 %v6973_v56, %v3395_v30 }
 0x2a6   : > { %v6976_v25 = vld [vmem:[#allocation8_spill] sm:$0xff] }
 0x2a9   : > { %v5321_v17 = vpop.f32.mrf.mxu1 }
 0x2aa   : > { %v3707_v18 = vadd.f32 %v5321_v17, %v3553_v48  ;;  %v6972_v17 = vld [vmem:[#allocation7_spill] sm:$0xff]  ;;  %v6977_v48 = vld [vmem:[#allocation9_spill] sm:$0xff] }
 0x2ab   : > { %v3666_v15 = vpop.f32.mrf.mxu1  ;;  %v3398_v29 = vadd.f32 %v6972_v17, %v3231_v41  ;;  %v3556_v53 = vadd.f32 %v6977_v48, %v3396_v22 }
 0x2ac   : > { %v3705_v32 = vadd.f32 %v3666_v15, %v3551_v45 }
 0x2ad   : > { %v5322_v6 = vpop.f32.mrf.mxu1 }
 0x2ae   : > { %v3708_v10 = vadd.f32 %v5322_v6, %v3554_v8 }
 0x2af   : > { %v3669_v35 = vpop.f32.mrf.mxu1 }
 0x2b1   : > { %v6850_v9 = vpop.f32.mrf.mxu1 }
 0x2b2   : > { %v5345_v20 = vpop.f32.mrf.mxu0  ;;  %6970 = vst [vmem:[#allocation10_spill] sm:$0xff] %v6850_v9  ;;  %v3071_v9 = vadd.f32 %v3034_v58, %v2892_v3 }
 0x2b3   : > { %v6852_v60 = vpop.f32.mrf.mxu1  ;;  %v3874_v38 = vadd.f32 %v5345_v20, %v3707_v18 }
 0x2b4   : > { %v3833_v23 = vpop.f32.mrf.mxu0  ;;  %v3225_v39 = vadd.f32 %v3188_v4, %v3071_v9  ;;  %v3397_v4 = vadd.f32 %v5277_v2, %v3230_v28  ;;  %v3709_v52 = vadd.f32 %v6852_v60, %v3555_v50 }
 0x2b5   : > { %v6854_v1 = vpop.f32.mrf.mxu1  ;;  %v3872_v59 = vadd.f32 %v3833_v23, %v3705_v32 }
 0x2b6   : > { %v5346_v42 = vpop.f32.mrf.mxu0  ;;  %v3392_v58 = vadd.f32 %v3355_v37, %v3225_v39  ;;  %v3557_v43 = vadd.f32 %v6840_v55, %v3397_v4  ;;  %v6879_v37 = vld [vmem:[%s6942_s7] ss:$0 sm:$0xff] }
 0x2b7   : > { %v3685_v63 = vpop.f32.mrf.mxu1  ;;  %v3875_v31 = vadd.f32 %v5346_v42, %v3708_v10  ;;  %v3558_v42 = vadd.f32 %v6976_v25, %v3398_v29 }
 0x2b8   : > { %v3836_v49 = vpop.f32.mrf.mxu0  ;;  %v3552_v14 = vadd.f32 %v3515_v62, %v3392_v58  ;;  %v3710_v11 = vadd.f32 %v3685_v63, %v3556_v53 }
 0x2b9   : > { %v6974_v15 = vld [vmem:[#allocation10_spill] sm:$0xff]  ;;  %v3712_v16 = vadd.f32 %v6854_v1, %v3558_v42 }
 0x2ba   : > { %v5349_v13 = vpop.f32.mrf.mxu0  ;;  %v3706_v2 = vadd.f32 %v3669_v35, %v3552_v14  ;;  %v3711_v55 = vadd.f32 %v6974_v15, %v3557_v43 }
 0x2bc   : > { %v3849_v27 = vpop.f32.mrf.mxu0  ;;  %v3873_v6 = vadd.f32 %v3836_v49, %v3706_v2  ;;  %v3878_v7 = vadd.f32 %v5349_v13, %v3711_v55 }
 0x2bd   : > { %v3876_v60 = vadd.f32 %v3849_v27, %v3709_v52 }
 0x2be   : > { %v5350_v20 = vpop.f32.mrf.mxu0 }
 0x2bf   : > { %v3879_v28 = vadd.f32 %v5350_v20, %v3712_v16 }
 0x2c0   : > { %v3852_v57 = vpop.f32.mrf.mxu0 }
 0x2c1   : > { %v3877_v12 = vadd.f32 %v3852_v57, %v3710_v11 }
 0x2c9   : > { %v5369_v44 = vpop.f32.mrf.mxu1 }
 0x2ca   : > { %v4034_v61 = vadd.f32 %v5369_v44, %v3874_v38 }
 0x2cb   : > { %v3993_v46 = vpop.f32.mrf.mxu1 }
 0x2cc   : > { %v4065_v62 = vmul.f32 %v6870_v36, %v4034_v61  ;;  %v4032_v21 = vadd.f32 %v3993_v46, %v3872_v59 }
 0x2cd   : > { %v5370_v33 = vpop.f32.mrf.mxu1 }
 0x2ce   : > { %v4080_v23 = vadd.f32 %v6879_v37, %v4065_v62  ;;  %v4063_v35 = vmul.f32 %v6870_v36, %v4032_v21  ;;  %v4035_v9 = vadd.f32 %v5370_v33, %v3875_v31 }
 0x2cf   : > { %v3996_v49 = vpop.f32.mrf.mxu1 }
 0x2d0   : > { %v4088_v24 = vmax.f32 %v4080_v23, 0.0  ;;  %v4078_v3 = vadd.f32 %v6879_v37, %v4063_v35  ;;  %v4066_v19 = vmul.f32 %v6870_v36, %v4035_v9  ;;  %v4033_v5 = vadd.f32 %v3996_v49, %v3873_v6 }
 0x2d1   : > { %v5373_v39 = vpop.f32.mrf.mxu1 }
 0x2d2   : > { %4096 = vst [vmem:[%s6895_s24 + $0x10] sm:$0xff] %v4088_v24  ;;  %v4086_v45 = vmax.f32 %v4078_v3, 0.0  ;;  %v4081_v18 = vadd.f32 %v6879_v37, %v4066_v19  ;;  %v4064_v13 = vmul.f32 %v6870_v36, %v4033_v5  ;;  %v4038_v47 = vadd.f32 %v5373_v39, %v3878_v7 }
 0x2d3   : > { %v4009_v58 = vpop.f32.mrf.mxu1 }
 0x2d4   : > { %4094 = vst [vmem:[%s6895_s24] sm:$0xff] %v4086_v45  ;;  %v4089_v8 = vmax.f32 %v4081_v18, 0.0  ;;  %v4079_v32 = vadd.f32 %v6879_v37, %v4064_v13  ;;  %v4069_v1 = vmul.f32 %v6870_v36, %v4038_v47  ;;  %v4036_v38 = vadd.f32 %v4009_v58, %v3876_v60 }
 0x2d5   : > { %v5374_v54 = vpop.f32.mrf.mxu1 }
 0x2d6   : > { %4097 = vst [vmem:[%s6895_s24 + $0x18] sm:$0xff] %v4089_v8  ;;  %v4087_v34 = vmax.f32 %v4079_v32, 0.0  ;;  %v4084_v4 = vadd.f32 %v6879_v37, %v4069_v1  ;;  %v4067_v63 = vmul.f32 %v6870_v36, %v4036_v38  ;;  %v4039_v44 = vadd.f32 %v5374_v54, %v3879_v28 }
 0x2d7   : > { %v4012_v14 = vpop.f32.mrf.mxu1 }
 0x2d8   : > { %4095 = vst [vmem:[%s6895_s24 + $0x8] sm:$0xff] %v4087_v34  ;;  %v4092_v10 = vmax.f32 %v4084_v4, 0.0  ;;  %v4082_v59 = vadd.f32 %v6879_v37, %v4067_v63  ;;  %v4070_v27 = vmul.f32 %v6870_v36, %v4039_v44  ;;  %v4037_v61 = vadd.f32 %v4012_v14, %v3877_v12 }
 0x2da   : > { %4100 = vst [vmem:[%s6895_s24 + $0x30] sm:$0xff] %v4092_v10  ;;  %v4090_v26 = vmax.f32 %v4082_v59, 0.0  ;;  %v4085_v41 = vadd.f32 %v6879_v37, %v4070_v27  ;;  %v4068_v30 = vmul.f32 %v6870_v36, %v4037_v61 }
 0x2dc   : > { %4098 = vst [vmem:[%s6895_s24 + $0x20] sm:$0xff] %v4090_v26  ;;  %v4093_v43 = vmax.f32 %v4085_v41, 0.0  ;;  %v4083_v46 = vadd.f32 %v6879_v37, %v4068_v30 }
 0x2de   : > { %4101 = vst [vmem:[%s6895_s24 + $0x38] sm:$0xff] %v4093_v43  ;;  %v4091_v2 = vmax.f32 %v4083_v46, 0.0 }
 0x2e0   : > { %4099 = vst [vmem:[%s6895_s24 + $0x28] sm:$0xff] %v4091_v2 }
 0x2e1 PF: > { %s18_s9 = sadd.s32 1, %s5608_s9   ;;  %s6978_s27 = smov %s5600_s29 }
 0x2e2   : > { %p15_p10 = scmp.ge.s32.totalorder %s18_s9, 10   ;;  %s6979_s28 = smov %s5604_s30 }
 0x2e3   : > { %s6980_s29 = smov %s6983_s10  ;;  %s6981_s30 = smov %s6987_s11 }
 0x2e4   :  { %17 = sbr.rel (!%p15_p10) target bundleno = 3 (0x3), region = 102 }

</bundles_post_ra>
